<compile_context>
chip_gen: v7x
topology: tpu7x:2x2x1
jax: 0.10.0
libtpu: 0.0.40
codegen_flags: <defaults>
</compile_context>

<pallas_src>
import jax
import jax.numpy as jnp
from jax.experimental import pallas as pl
from jax.experimental.pallas import tpu as pltpu


def _round_up(n, m):
    return ((n + m - 1) // m) * m


def _lstm_recurrence_kernel(x_ref, wih_ref, whh_ref, b_ref, hs_ref, xg_scr):
    """Single invocation: whole (padded) sequence resident in VMEM.

    x_ref  : (T*Bp, Dp)    time-major inputs flattened over (t, batch)
    wih_ref: (Dp, 4*Hp)    input -> gates weights (pre-transposed, gate-padded)
    whh_ref: (Hp, 4*Hp)    hidden -> gates weights
    b_ref  : (1, 4*Hp)     b_ih + b_hh (pre-summed)
    hs_ref : (T, Bp, Hp)   output hidden states (time-major)
    xg_scr : (T*Bp, 4*Hp)  scratch: hoisted input projection for all steps
    """
    T, Bp, Hp = hs_ref.shape

    # Hoisted (non-recurrent) input projection: one big lane-dense MXU matmul
    # covering every time step, instead of a tiny matmul per step.
    xg_scr[...] = (
        jnp.dot(x_ref[...], wih_ref[...], preferred_element_type=jnp.float32)
        + b_ref[...]
    )

    def step(t, carry):
        h, c = carry
        # Per-step gates = precomputed input part + recurrent part.
        gates = xg_scr[pl.ds(t * Bp, Bp), :] + jnp.dot(
            h, whh_ref[...], preferred_element_type=jnp.float32
        )
        # PyTorch LSTM gate order: input, forget, cell(g), output.
        i_g = jax.nn.sigmoid(gates[:, 0 * Hp:1 * Hp])
        f_g = jax.nn.sigmoid(gates[:, 1 * Hp:2 * Hp])
        g_g = jnp.tanh(gates[:, 2 * Hp:3 * Hp])
        o_g = jax.nn.sigmoid(gates[:, 3 * Hp:4 * Hp])
        c_new = f_g * c + i_g * g_g
        h_new = o_g * jnp.tanh(c_new)
        hs_ref[t] = h_new.astype(hs_ref.dtype)
        return (h_new, c_new)

    h0 = jnp.zeros((Bp, Hp), jnp.float32)
    # Short fixed T: fully unroll so the LLO scheduler sees straight-line code;
    # h/c live in vregs, not VMEM scratch.
    jax.lax.fori_loop(0, T, step, (h0, h0), unroll=True)


def _fc_kernel(h_ref, w_ref, b_ref, out_ref):
    """Hoisted vocab projection: (T*Bp, Hp) @ (Hp, tn) + bias, lane-dense."""
    out_ref[...] = (
        jnp.dot(h_ref[...], w_ref[...], preferred_element_type=jnp.float32)
        + b_ref[...]
    ).astype(out_ref.dtype)


def _pad_gate_cols(w, H, Hp):
    """Pad the trailing (4*H) gate axis to (4*Hp), per gate block."""
    lead = w.shape[:-1]
    w4 = w.reshape(lead + (4, H))
    w4 = jnp.pad(w4, [(0, 0)] * len(lead) + [(0, 0), (0, Hp - H)])
    return w4.reshape(lead + (4 * Hp,))


def generator_forward(params, noise, prev_chars):
    """JAX wrapper replicating Generator.forward.

    noise      : (B, latent_dim)  float32
    prev_chars : (B, T)           int32 token ids
    returns    : (B, T, vocab_size) float32
    """
    emb = params["embedding"]          # (V, E)
    w_ih_t = params["w_ih_t"]          # (E+L, 4H)
    w_hh_t = params["w_hh_t"]          # (H, 4H)
    b_ih = params["b_ih"]              # (1, 4H)
    b_hh = params["b_hh"]              # (1, 4H)
    w_fc_t = params["w_fc_t"]          # (H, V)
    b_fc = params["b_fc"]              # (1, V)

    B, T = prev_chars.shape
    V, E = emb.shape
    L = noise.shape[-1]
    D_in = E + L
    H = w_hh_t.shape[0]

    # TPU-friendly padded sizes (f32 sublane = 8, lane = 128).
    Bp = _round_up(B, 8)
    Hp = _round_up(H, 128)      # per-gate width -> lane-aligned gate slices
    Dp = _round_up(D_in, 128)
    Vp = _round_up(V, 128)
    G = 4 * Hp
    M = T * Bp

    # Glue: embedding gather + noise broadcast, built time-major directly
    # (only the tiny (B, T) id matrix is transposed, not the activations).
    ids_tm = jnp.transpose(prev_chars)                        # (T, B)
    char_embeds = jnp.take(emb, ids_tm, axis=0)               # (T, B, E)
    noise_tm = jnp.broadcast_to(noise[None], (T, B, L))       # (T, B, L)
    x_tm = jnp.concatenate([char_embeds, noise_tm], axis=-1).astype(jnp.float32)
    x_tm = jnp.pad(x_tm, ((0, 0), (0, Bp - B), (0, Dp - D_in)))
    x_flat = x_tm.reshape(M, Dp)                              # (T*Bp, Dp)

    # Weights: pre-transposed and zero-padded; gate blocks padded H -> Hp so
    # in-kernel gate slices stay lane-aligned.  Padded h/c lanes remain exactly
    # zero through the recurrence (zero weight rows/cols), so no leakage.
    w_ih_p = jnp.pad(_pad_gate_cols(w_ih_t.astype(jnp.float32), H, Hp),
                     ((0, Dp - D_in), (0, 0)))                # (Dp, G)
    w_hh_p = jnp.pad(_pad_gate_cols(w_hh_t.astype(jnp.float32), H, Hp),
                     ((0, Hp - H), (0, 0)))                   # (Hp, G)
    b_p = _pad_gate_cols((b_ih + b_hh).astype(jnp.float32), H, Hp)   # (1, G)
    w_fc_p = jnp.pad(w_fc_t.astype(jnp.float32),
                     ((0, Hp - H), (0, Vp - V)))              # (Hp, Vp)
    b_fc_p = jnp.pad(b_fc.astype(jnp.float32), ((0, 0), (0, Vp - V)))  # (1, Vp)

    # Kernel 1: the sequential LSTM recurrence (grid collapsed to a single
    # invocation; h/c carried as fori_loop values instead of VMEM scratch).
    hs = pl.pallas_call(
        _lstm_recurrence_kernel,
        out_shape=jax.ShapeDtypeStruct((T, Bp, Hp), jnp.float32),
        grid_spec=pltpu.PrefetchScalarGridSpec(
            num_scalar_prefetch=0,
            grid=(1,),
            in_specs=[
                pl.BlockSpec((M, Dp), lambda i: (0, 0)),
                pl.BlockSpec((Dp, G), lambda i: (0, 0)),
                pl.BlockSpec((Hp, G), lambda i: (0, 0)),
                pl.BlockSpec((1, G), lambda i: (0, 0)),
            ],
            out_specs=pl.BlockSpec((T, Bp, Hp), lambda i: (0, 0, 0)),
            scratch_shapes=[pltpu.VMEM((M, G), jnp.float32)],
        ),
        compiler_params=pltpu.CompilerParams(
            dimension_semantics=("arbitrary",),   # sequential recurrence
        ),
    )(x_flat, w_ih_p, w_hh_p, b_p)

    # Kernel 2: vocab projection hoisted out of the time loop — one big
    # lane-dense matmul over all (t, b) rows, tiled over V with a parallel
    # grid (keeps the vocab-sized weight out of the recurrent kernel's VMEM
    # and lets megacore shard it on v7x).
    tn = 128
    hs2d = hs.reshape(M, Hp)                                  # layout-preserving
    logits2d = pl.pallas_call(
        _fc_kernel,
        out_shape=jax.ShapeDtypeStruct((M, Vp), jnp.float32),
        grid_spec=pltpu.PrefetchScalarGridSpec(
            num_scalar_prefetch=0,
            grid=(Vp // tn,),
            in_specs=[
                pl.BlockSpec((M, Hp), lambda j: (0, 0)),
                pl.BlockSpec((Hp, tn), lambda j: (0, j)),
                pl.BlockSpec((1, tn), lambda j: (0, j)),
            ],
            out_specs=pl.BlockSpec((M, tn), lambda j: (0, j)),
        ),
        compiler_params=pltpu.CompilerParams(
            dimension_semantics=("parallel",),
        ),
    )(hs2d, w_fc_p, b_fc_p)

    # Back to PyTorch's batch-first layout, drop padding.
    # TODO(synk): the final (T,Bp,Vp)->(Bp,T,Vp) transpose could be folded into
    # the FC kernel's output index_map once sub-(8)-sublane output blocks are
    # guaranteed supported; for now it is one small XLA copy.
    logits = logits2d.reshape(T, Bp, Vp)
    return jnp.transpose(logits, (1, 0, 2))[:B, :, :V]


def _reference_forward(params, noise, prev_chars):
    """Pure-JAX reference (PyTorch LSTM semantics) for a correctness check."""
    emb = params["embedding"]
    B, T = prev_chars.shape
    H = params["w_hh_t"].shape[0]
    char_embeds = jnp.take(emb, prev_chars, axis=0)
    noise_exp = jnp.broadcast_to(noise[:, None, :], (B, T, noise.shape[-1]))
    x = jnp.concatenate([char_embeds, noise_exp], axis=2)

    def step(carry, x_t):
        h, c = carry
        gates = (x_t @ params["w_ih_t"] + h @ params["w_hh_t"]
                 + params["b_ih"][0] + params["b_hh"][0])
        i = jax.nn.sigmoid(gates[:, :H])
        f = jax.nn.sigmoid(gates[:, H:2 * H])
        g = jnp.tanh(gates[:, 2 * H:3 * H])
        o = jax.nn.sigmoid(gates[:, 3 * H:4 * H])
        c = f * c + i * g
        h = o * jnp.tanh(c)
        return (h, c), h

    h0 = jnp.zeros((B, H), jnp.float32)
    (_, _), hs = jax.lax.scan(step, (h0, h0), jnp.transpose(x, (1, 0, 2)))
    out = hs @ params["w_fc_t"] + params["b_fc"][0]
    return jnp.transpose(out, (1, 0, 2))


def init_params(key, vocab_size, embedding_dim, hidden_dim, latent_dim):
    ks = jax.random.split(key, 7)
    d_in = embedding_dim + latent_dim
    s = 0.1
    return {
        "embedding": s * jax.random.normal(ks[0], (vocab_size, embedding_dim), jnp.float32),
        # stored pre-transposed relative to PyTorch's (4H, D) layout
        "w_ih_t": s * jax.random.normal(ks[1], (d_in, 4 * hidden_dim), jnp.float32),
        "w_hh_t": s * jax.random.normal(ks[2], (hidden_dim, 4 * hidden_dim), jnp.float32),
        "b_ih": s * jax.random.normal(ks[3], (1, 4 * hidden_dim), jnp.float32),
        "b_hh": s * jax.random.normal(ks[4], (1, 4 * hidden_dim), jnp.float32),
        "w_fc_t": s * jax.random.normal(ks[5], (hidden_dim, vocab_size), jnp.float32),
        "b_fc": s * jax.random.normal(ks[6], (1, vocab_size), jnp.float32),
    }


if __name__ == "__main__":
    vocab_size, embedding_dim, hidden_dim, latent_dim = 32, 16, 32, 16
    batch, seq_len = 2, 8

    key = jax.random.PRNGKey(0)
    k_par, k_noise, k_chars = jax.random.split(key, 3)

    params = init_params(k_par, vocab_size, embedding_dim, hidden_dim, latent_dim)
    noise = jax.random.normal(k_noise, (batch, latent_dim), jnp.float32)
    prev_chars = jax.random.randint(k_chars, (batch, seq_len), 0, vocab_size,
                                    dtype=jnp.int32)

    fwd = jax.jit(generator_forward)
    out = jax.block_until_ready(fwd(params, noise, prev_chars))
    assert out.shape == (batch, seq_len, vocab_size)
    assert bool(jnp.all(jnp.isfinite(out)))

    ref = _reference_forward(params, noise, prev_chars)
    assert bool(jnp.allclose(out, ref, rtol=1e-2, atol=1e-2))

    print("KERNEL_OK")
</pallas_src>

<mosaic_0001>
module attributes {stable_mosaic.version = 11 : i64} {
  func.func @_fc_kernel(%arg0: i32, %arg1: memref<64x128xf32, #tpu.memory_space<vmem>>, %arg2: memref<128x128xf32, #tpu.memory_space<vmem>>, %arg3: memref<1x128xf32, #tpu.memory_space<vmem>>, %arg4: memref<64x128xf32, #tpu.memory_space<vmem>>) attributes {dimension_semantics = [#tpu.dimension_semantics<parallel>], iteration_bounds = array<i64: 1>, scalar_prefetch = 0 : i64, scratch_operands = 0 : i64, tpu.core_type = #tpu.core_type<tc>, window_params = [{pipeline_mode = #tpu.pipeline_mode<synchronous>, transform_indices = @transform_0, window_bounds = array<i64: 64, 128>}, {transform_indices = @transform_1, window_bounds = array<i64: 128, 128>}, {transform_indices = @transform_2, window_bounds = array<i64: 1, 128>}, {transform_indices = @transform_3, window_bounds = array<i64: 64, 128>}]} {
    %c0 = arith.constant 0 : index
    %c0_0 = arith.constant 0 : index
    %0 = vector.load %arg1[%c0, %c0_0] : memref<64x128xf32, #tpu.memory_space<vmem>>, vector<64x128xf32>
    %c0_1 = arith.constant 0 : index
    %c0_2 = arith.constant 0 : index
    %1 = vector.load %arg2[%c0_1, %c0_2] : memref<128x128xf32, #tpu.memory_space<vmem>>, vector<128x128xf32>
    %cst = arith.constant dense<0.000000e+00> : vector<64x128xf32>
    %2 = tpu.matmul %0, %1, %cst {dimension_numbers = #tpu.dot_dimension_numbers<[1], [0], [0], [1], [0, 0, 1, 1], [], []>} : vector<64x128xf32>, vector<128x128xf32>, vector<64x128xf32> -> vector<64x128xf32>
    %c0_3 = arith.constant 0 : index
    %c0_4 = arith.constant 0 : index
    %3 = vector.load %arg3[%c0_3, %c0_4] : memref<1x128xf32, #tpu.memory_space<vmem>>, vector<1x128xf32>
    %4 = vector.broadcast %3 : vector<1x128xf32> to vector<64x128xf32>
    %5 = arith.addf %2, %4 : vector<64x128xf32>
    %c0_5 = arith.constant 0 : index
    %c0_6 = arith.constant 0 : index
    %6 = vector.load %arg4[%c0_5, %c0_6] : memref<64x128xf32, #tpu.memory_space<vmem>>, vector<64x128xf32>
    tpu.vector_store %arg4[%c0_5, %c0_6], %5 {strides = array<i32>} : memref<64x128xf32, #tpu.memory_space<vmem>>, vector<64x128xf32>,
    return
  }
  func.func @transform_0(%arg0: i32) -> (i32, i32) {
    %c0_i32 = arith.constant 0 : i32
    %c0_i32_0 = arith.constant 0 : i32
    %c0_i32_1 = arith.constant 0 : i32
    return %c0_i32, %c0_i32_0 : i32, i32
  }
  func.func @transform_1(%arg0: i32) -> (i32, i32) {
    %c0_i32 = arith.constant 0 : i32
    %c0_i32_0 = arith.constant 0 : i32
    return %c0_i32, %arg0 : i32, i32
  }
  func.func @transform_2(%arg0: i32) -> (i32, i32) {
    %c0_i32 = arith.constant 0 : i32
    %c0_i32_0 = arith.constant 0 : i32
    return %c0_i32, %arg0 : i32, i32
  }
  func.func @transform_3(%arg0: i32) -> (i32, i32) {
    %c0_i32 = arith.constant 0 : i32
    %c0_i32_0 = arith.constant 0 : i32
    return %c0_i32, %arg0 : i32, i32
  }
}

module attributes {stable_mosaic.version = 11 : i64} {
  func.func @_lstm_recurrence_kernel(%arg0: i32, %arg1: memref<64x128xf32, #tpu.memory_space<vmem>>, %arg2: memref<128x512xf32, #tpu.memory_space<vmem>>, %arg3: memref<128x512xf32, #tpu.memory_space<vmem>>, %arg4: memref<1x512xf32, #tpu.memory_space<vmem>>, %arg5: memref<8x8x128xf32, #tpu.memory_space<vmem>>, %arg6: memref<64x512xf32, #tpu.memory_space<vmem>>) attributes {dimension_semantics = [#tpu.dimension_semantics<arbitrary>], iteration_bounds = array<i64: 1>, scalar_prefetch = 0 : i64, scratch_operands = 1 : i64, tpu.core_type = #tpu.core_type<tc>, window_params = [{pipeline_mode = #tpu.pipeline_mode<synchronous>, transform_indices = @transform_0, window_bounds = array<i64: 64, 128>}, {pipeline_mode = #tpu.pipeline_mode<synchronous>, transform_indices = @transform_1, window_bounds = array<i64: 128, 512>}, {pipeline_mode = #tpu.pipeline_mode<synchronous>, transform_indices = @transform_2, window_bounds = array<i64: 128, 512>}, {pipeline_mode = #tpu.pipeline_mode<synchronous>, transform_indices = @transform_3, window_bounds = array<i64: 1, 512>}, {pipeline_mode = #tpu.pipeline_mode<synchronous>, transform_indices = @transform_4, window_bounds = array<i64: 8, 8, 128>}]} {
    %c0 = arith.constant 0 : index
    %c0_0 = arith.constant 0 : index
    %0 = vector.load %arg1[%c0, %c0_0] : memref<64x128xf32, #tpu.memory_space<vmem>>, vector<64x128xf32>
    %c0_1 = arith.constant 0 : index
    %c0_2 = arith.constant 0 : index
    %1 = vector.load %arg2[%c0_1, %c0_2] : memref<128x512xf32, #tpu.memory_space<vmem>>, vector<128x512xf32>
    %cst = arith.constant dense<0.000000e+00> : vector<64x512xf32>
    %2 = tpu.matmul %0, %1, %cst {dimension_numbers = #tpu.dot_dimension_numbers<[1], [0], [0], [1], [0, 0, 1, 1], [], []>} : vector<64x128xf32>, vector<128x512xf32>, vector<64x512xf32> -> vector<64x512xf32>
    %c0_3 = arith.constant 0 : index
    %c0_4 = arith.constant 0 : index
    %3 = vector.load %arg4[%c0_3, %c0_4] : memref<1x512xf32, #tpu.memory_space<vmem>>, vector<1x512xf32>
    %4 = vector.broadcast %3 : vector<1x512xf32> to vector<64x512xf32>
    %5 = arith.addf %2, %4 : vector<64x512xf32>
    %c0_5 = arith.constant 0 : index
    %c0_6 = arith.constant 0 : index
    %6 = vector.load %arg6[%c0_5, %c0_6] : memref<64x512xf32, #tpu.memory_space<vmem>>, vector<64x512xf32>
    tpu.vector_store %arg6[%c0_5, %c0_6], %5 {strides = array<i32>} : memref<64x512xf32, #tpu.memory_space<vmem>>, vector<64x512xf32>,
    %cst_7 = arith.constant 0.000000e+00 : f32
    %7 = vector.broadcast %cst_7 : f32 to vector<8x128xf32>
    %c0_i32 = arith.constant 0 : i32
    %c8_i32 = arith.constant 8 : i32
    %8 = arith.muli %c0_i32, %c8_i32 : i32
    %9 = arith.index_cast %8 : i32 to index
    %c0_8 = arith.constant 0 : index
    %10 = vector.load %arg6[%9, %c0_8] : memref<64x512xf32, #tpu.memory_space<vmem>>, vector<8x512xf32>
    %c0_9 = arith.constant 0 : index
    %c0_10 = arith.constant 0 : index
    %11 = vector.load %arg3[%c0_9, %c0_10] : memref<128x512xf32, #tpu.memory_space<vmem>>, vector<128x512xf32>
    %cst_11 = arith.constant dense<0.000000e+00> : vector<8x512xf32>
    %12 = tpu.matmul %7, %11, %cst_11 {dimension_numbers = #tpu.dot_dimension_numbers<[1], [0], [0], [1], [0, 0, 1, 1], [], []>} : vector<8x128xf32>, vector<128x512xf32>, vector<8x512xf32> -> vector<8x512xf32>
    %13 = arith.addf %10, %12 : vector<8x512xf32>
    %14 = vector.extract_strided_slice %13 {offsets = [0, 0], sizes = [8, 128], strides = [1, 1]} : vector<8x512xf32> to vector<8x128xf32>
    %15 = arith.negf %14 : vector<8x128xf32>
    %16 = math.exp %15 : vector<8x128xf32>
    %cst_12 = arith.constant 1.000000e+00 : f32
    %17 = vector.broadcast %cst_12 : f32 to vector<8x128xf32>
    %18 = arith.addf %17, %16 : vector<8x128xf32>
    %19 = arith.divf %17, %18 : vector<8x128xf32>
    %20 = vector.extract_strided_slice %13 {offsets = [0, 128], sizes = [8, 128], strides = [1, 1]} : vector<8x512xf32> to vector<8x128xf32>
    %21 = arith.negf %20 : vector<8x128xf32>
    %22 = math.exp %21 : vector<8x128xf32>
    %cst_13 = arith.constant 1.000000e+00 : f32
    %23 = vector.broadcast %cst_13 : f32 to vector<8x128xf32>
    %24 = arith.addf %23, %22 : vector<8x128xf32>
    %25 = arith.divf %23, %24 : vector<8x128xf32>
    %26 = vector.extract_strided_slice %13 {offsets = [0, 256], sizes = [8, 128], strides = [1, 1]} : vector<8x512xf32> to vector<8x128xf32>
    %27 = math.tanh %26 : vector<8x128xf32>
    %28 = vector.extract_strided_slice %13 {offsets = [0, 384], sizes = [8, 128], strides = [1, 1]} : vector<8x512xf32> to vector<8x128xf32>
    %29 = arith.negf %28 : vector<8x128xf32>
    %30 = math.exp %29 : vector<8x128xf32>
    %cst_14 = arith.constant 1.000000e+00 : f32
    %31 = vector.broadcast %cst_14 : f32 to vector<8x128xf32>
    %32 = arith.addf %31, %30 : vector<8x128xf32>
    %33 = arith.divf %31, %32 : vector<8x128xf32>
    %34 = arith.mulf %25, %7 : vector<8x128xf32>
    %35 = arith.mulf %19, %27 : vector<8x128xf32>
    %36 = arith.addf %34, %35 : vector<8x128xf32>
    %37 = math.tanh %36 : vector<8x128xf32>
    %38 = arith.mulf %33, %37 : vector<8x128xf32>
    %39 = arith.index_cast %c0_i32 : i32 to index
    %c0_15 = arith.constant 0 : index
    %c0_16 = arith.constant 0 : index
    %40 = vector.load %arg5[%39, %c0_15, %c0_16] : memref<8x8x128xf32, #tpu.memory_space<vmem>>, vector<1x8x128xf32>
    %41 = vector.shape_cast %40 : vector<1x8x128xf32> to vector<8x128xf32>
    %42 = vector.shape_cast %38 : vector<8x128xf32> to vector<1x8x128xf32>
    tpu.vector_store %arg5[%39, %c0_15, %c0_16], %42 {strides = array<i32>} : memref<8x8x128xf32, #tpu.memory_space<vmem>>, vector<1x8x128xf32>,
    %c1_i32 = arith.constant 1 : i32
    %c8_i32_17 = arith.constant 8 : i32
    %43 = arith.muli %c1_i32, %c8_i32_17 : i32
    %44 = arith.index_cast %43 : i32 to index
    %c0_18 = arith.constant 0 : index
    %45 = vector.load %arg6[%44, %c0_18] : memref<64x512xf32, #tpu.memory_space<vmem>>, vector<8x512xf32>
    %c0_19 = arith.constant 0 : index
    %c0_20 = arith.constant 0 : index
    %46 = vector.load %arg3[%c0_19, %c0_20] : memref<128x512xf32, #tpu.memory_space<vmem>>, vector<128x512xf32>
    %cst_21 = arith.constant dense<0.000000e+00> : vector<8x512xf32>
    %47 = tpu.matmul %38, %46, %cst_21 {dimension_numbers = #tpu.dot_dimension_numbers<[1], [0], [0], [1], [0, 0, 1, 1], [], []>} : vector<8x128xf32>, vector<128x512xf32>, vector<8x512xf32> -> vector<8x512xf32>
    %48 = arith.addf %45, %47 : vector<8x512xf32>
    %49 = vector.extract_strided_slice %48 {offsets = [0, 0], sizes = [8, 128], strides = [1, 1]} : vector<8x512xf32> to vector<8x128xf32>
    %50 = arith.negf %49 : vector<8x128xf32>
    %51 = math.exp %50 : vector<8x128xf32>
    %cst_22 = arith.constant 1.000000e+00 : f32
    %52 = vector.broadcast %cst_22 : f32 to vector<8x128xf32>
    %53 = arith.addf %52, %51 : vector<8x128xf32>
    %54 = arith.divf %52, %53 : vector<8x128xf32>
    %55 = vector.extract_strided_slice %48 {offsets = [0, 128], sizes = [8, 128], strides = [1, 1]} : vector<8x512xf32> to vector<8x128xf32>
    %56 = arith.negf %55 : vector<8x128xf32>
    %57 = math.exp %56 : vector<8x128xf32>
    %cst_23 = arith.constant 1.000000e+00 : f32
    %58 = vector.broadcast %cst_23 : f32 to vector<8x128xf32>
    %59 = arith.addf %58, %57 : vector<8x128xf32>
    %60 = arith.divf %58, %59 : vector<8x128xf32>
    %61 = vector.extract_strided_slice %48 {offsets = [0, 256], sizes = [8, 128], strides = [1, 1]} : vector<8x512xf32> to vector<8x128xf32>
    %62 = math.tanh %61 : vector<8x128xf32>
    %63 = vector.extract_strided_slice %48 {offsets = [0, 384], sizes = [8, 128], strides = [1, 1]} : vector<8x512xf32> to vector<8x128xf32>
    %64 = arith.negf %63 : vector<8x128xf32>
    %65 = math.exp %64 : vector<8x128xf32>
    %cst_24 = arith.constant 1.000000e+00 : f32
    %66 = vector.broadcast %cst_24 : f32 to vector<8x128xf32>
    %67 = arith.addf %66, %65 : vector<8x128xf32>
    %68 = arith.divf %66, %67 : vector<8x128xf32>
    %69 = arith.mulf %60, %36 : vector<8x128xf32>
    %70 = arith.mulf %54, %62 : vector<8x128xf32>
    %71 = arith.addf %69, %70 : vector<8x128xf32>
    %72 = math.tanh %71 : vector<8x128xf32>
    %73 = arith.mulf %68, %72 : vector<8x128xf32>
    %74 = arith.index_cast %c1_i32 : i32 to index
    %c0_25 = arith.constant 0 : index
    %c0_26 = arith.constant 0 : index
    %75 = vector.load %arg5[%74, %c0_25, %c0_26] : memref<8x8x128xf32, #tpu.memory_space<vmem>>, vector<1x8x128xf32>
    %76 = vector.shape_cast %75 : vector<1x8x128xf32> to vector<8x128xf32>
    %77 = vector.shape_cast %73 : vector<8x128xf32> to vector<1x8x128xf32>
    tpu.vector_store %arg5[%74, %c0_25, %c0_26], %77 {strides = array<i32>} : memref<8x8x128xf32, #tpu.memory_space<vmem>>, vector<1x8x128xf32>,
    %c2_i32 = arith.constant 2 : i32
    %c8_i32_27 = arith.constant 8 : i32
    %78 = arith.muli %c2_i32, %c8_i32_27 : i32
    %79 = arith.index_cast %78 : i32 to index
    %c0_28 = arith.constant 0 : index
    %80 = vector.load %arg6[%79, %c0_28] : memref<64x512xf32, #tpu.memory_space<vmem>>, vector<8x512xf32>
    %c0_29 = arith.constant 0 : index
    %c0_30 = arith.constant 0 : index
    %81 = vector.load %arg3[%c0_29, %c0_30] : memref<128x512xf32, #tpu.memory_space<vmem>>, vector<128x512xf32>
    %cst_31 = arith.constant dense<0.000000e+00> : vector<8x512xf32>
    %82 = tpu.matmul %73, %81, %cst_31 {dimension_numbers = #tpu.dot_dimension_numbers<[1], [0], [0], [1], [0, 0, 1, 1], [], []>} : vector<8x128xf32>, vector<128x512xf32>, vector<8x512xf32> -> vector<8x512xf32>
    %83 = arith.addf %80, %82 : vector<8x512xf32>
    %84 = vector.extract_strided_slice %83 {offsets = [0, 0], sizes = [8, 128], strides = [1, 1]} : vector<8x512xf32> to vector<8x128xf32>
    %85 = arith.negf %84 : vector<8x128xf32>
    %86 = math.exp %85 : vector<8x128xf32>
    %cst_32 = arith.constant 1.000000e+00 : f32
    %87 = vector.broadcast %cst_32 : f32 to vector<8x128xf32>
    %88 = arith.addf %87, %86 : vector<8x128xf32>
    %89 = arith.divf %87, %88 : vector<8x128xf32>
    %90 = vector.extract_strided_slice %83 {offsets = [0, 128], sizes = [8, 128], strides = [1, 1]} : vector<8x512xf32> to vector<8x128xf32>
    %91 = arith.negf %90 : vector<8x128xf32>
    %92 = math.exp %91 : vector<8x128xf32>
    %cst_33 = arith.constant 1.000000e+00 : f32
    %93 = vector.broadcast %cst_33 : f32 to vector<8x128xf32>
    %94 = arith.addf %93, %92 : vector<8x128xf32>
    %95 = arith.divf %93, %94 : vector<8x128xf32>
    %96 = vector.extract_strided_slice %83 {offsets = [0, 256], sizes = [8, 128], strides = [1, 1]} : vector<8x512xf32> to vector<8x128xf32>
    %97 = math.tanh %96 : vector<8x128xf32>
    %98 = vector.extract_strided_slice %83 {offsets = [0, 384], sizes = [8, 128], strides = [1, 1]} : vector<8x512xf32> to vector<8x128xf32>
    %99 = arith.negf %98 : vector<8x128xf32>
    %100 = math.exp %99 : vector<8x128xf32>
    %cst_34 = arith.constant 1.000000e+00 : f32
    %101 = vector.broadcast %cst_34 : f32 to vector<8x128xf32>
    %102 = arith.addf %101, %100 : vector<8x128xf32>
    %103 = arith.divf %101, %102 : vector<8x128xf32>
    %104 = arith.mulf %95, %71 : vector<8x128xf32>
    %105 = arith.mulf %89, %97 : vector<8x128xf32>
    %106 = arith.addf %104, %105 : vector<8x128xf32>
    %107 = math.tanh %106 : vector<8x128xf32>
    %108 = arith.mulf %103, %107 : vector<8x128xf32>
    %109 = arith.index_cast %c2_i32 : i32 to index
    %c0_35 = arith.constant 0 : index
    %c0_36 = arith.constant 0 : index
    %110 = vector.load %arg5[%109, %c0_35, %c0_36] : memref<8x8x128xf32, #tpu.memory_space<vmem>>, vector<1x8x128xf32>
    %111 = vector.shape_cast %110 : vector<1x8x128xf32> to vector<8x128xf32>
    %112 = vector.shape_cast %108 : vector<8x128xf32> to vector<1x8x128xf32>
    tpu.vector_store %arg5[%109, %c0_35, %c0_36], %112 {strides = array<i32>} : memref<8x8x128xf32, #tpu.memory_space<vmem>>, vector<1x8x128xf32>,
    %c3_i32 = arith.constant 3 : i32
    %c8_i32_37 = arith.constant 8 : i32
    %113 = arith.muli %c3_i32, %c8_i32_37 : i32
    %114 = arith.index_cast %113 : i32 to index
    %c0_38 = arith.constant 0 : index
    %115 = vector.load %arg6[%114, %c0_38] : memref<64x512xf32, #tpu.memory_space<vmem>>, vector<8x512xf32>
    %c0_39 = arith.constant 0 : index
    %c0_40 = arith.constant 0 : index
    %116 = vector.load %arg3[%c0_39, %c0_40] : memref<128x512xf32, #tpu.memory_space<vmem>>, vector<128x512xf32>
    %cst_41 = arith.constant dense<0.000000e+00> : vector<8x512xf32>
    %117 = tpu.matmul %108, %116, %cst_41 {dimension_numbers = #tpu.dot_dimension_numbers<[1], [0], [0], [1], [0, 0, 1, 1], [], []>} : vector<8x128xf32>, vector<128x512xf32>, vector<8x512xf32> -> vector<8x512xf32>
    %118 = arith.addf %115, %117 : vector<8x512xf32>
    %119 = vector.extract_strided_slice %118 {offsets = [0, 0], sizes = [8, 128], strides = [1, 1]} : vector<8x512xf32> to vector<8x128xf32>
    %120 = arith.negf %119 : vector<8x128xf32>
    %121 = math.exp %120 : vector<8x128xf32>
    %cst_42 = arith.constant 1.000000e+00 : f32
    %122 = vector.broadcast %cst_42 : f32 to vector<8x128xf32>
    %123 = arith.addf %122, %121 : vector<8x128xf32>
    %124 = arith.divf %122, %123 : vector<8x128xf32>
    %125 = vector.extract_strided_slice %118 {offsets = [0, 128], sizes = [8, 128], strides = [1, 1]} : vector<8x512xf32> to vector<8x128xf32>
    %126 = arith.negf %125 : vector<8x128xf32>
    %127 = math.exp %126 : vector<8x128xf32>
    %cst_43 = arith.constant 1.000000e+00 : f32
    %128 = vector.broadcast %cst_43 : f32 to vector<8x128xf32>
    %129 = arith.addf %128, %127 : vector<8x128xf32>
    %130 = arith.divf %128, %129 : vector<8x128xf32>
    %131 = vector.extract_strided_slice %118 {offsets = [0, 256], sizes = [8, 128], strides = [1, 1]} : vector<8x512xf32> to vector<8x128xf32>
    %132 = math.tanh %131 : vector<8x128xf32>
    %133 = vector.extract_strided_slice %118 {offsets = [0, 384], sizes = [8, 128], strides = [1, 1]} : vector<8x512xf32> to vector<8x128xf32>
    %134 = arith.negf %133 : vector<8x128xf32>
    %135 = math.exp %134 : vector<8x128xf32>
    %cst_44 = arith.constant 1.000000e+00 : f32
    %136 = vector.broadcast %cst_44 : f32 to vector<8x128xf32>
    %137 = arith.addf %136, %135 : vector<8x128xf32>
    %138 = arith.divf %136, %137 : vector<8x128xf32>
    %139 = arith.mulf %130, %106 : vector<8x128xf32>
    %140 = arith.mulf %124, %132 : vector<8x128xf32>
    %141 = arith.addf %139, %140 : vector<8x128xf32>
    %142 = math.tanh %141 : vector<8x128xf32>
    %143 = arith.mulf %138, %142 : vector<8x128xf32>
    %144 = arith.index_cast %c3_i32 : i32 to index
    %c0_45 = arith.constant 0 : index
    %c0_46 = arith.constant 0 : index
    %145 = vector.load %arg5[%144, %c0_45, %c0_46] : memref<8x8x128xf32, #tpu.memory_space<vmem>>, vector<1x8x128xf32>
    %146 = vector.shape_cast %145 : vector<1x8x128xf32> to vector<8x128xf32>
    %147 = vector.shape_cast %143 : vector<8x128xf32> to vector<1x8x128xf32>
    tpu.vector_store %arg5[%144, %c0_45, %c0_46], %147 {strides = array<i32>} : memref<8x8x128xf32, #tpu.memory_space<vmem>>, vector<1x8x128xf32>,
    %c4_i32 = arith.constant 4 : i32
    %c8_i32_47 = arith.constant 8 : i32
    %148 = arith.muli %c4_i32, %c8_i32_47 : i32
    %149 = arith.index_cast %148 : i32 to index
    %c0_48 = arith.constant 0 : index
    %150 = vector.load %arg6[%149, %c0_48] : memref<64x512xf32, #tpu.memory_space<vmem>>, vector<8x512xf32>
    %c0_49 = arith.constant 0 : index
    %c0_50 = arith.constant 0 : index
    %151 = vector.load %arg3[%c0_49, %c0_50] : memref<128x512xf32, #tpu.memory_space<vmem>>, vector<128x512xf32>
    %cst_51 = arith.constant dense<0.000000e+00> : vector<8x512xf32>
    %152 = tpu.matmul %143, %151, %cst_51 {dimension_numbers = #tpu.dot_dimension_numbers<[1], [0], [0], [1], [0, 0, 1, 1], [], []>} : vector<8x128xf32>, vector<128x512xf32>, vector<8x512xf32> -> vector<8x512xf32>
    %153 = arith.addf %150, %152 : vector<8x512xf32>
    %154 = vector.extract_strided_slice %153 {offsets = [0, 0], sizes = [8, 128], strides = [1, 1]} : vector<8x512xf32> to vector<8x128xf32>
    %155 = arith.negf %154 : vector<8x128xf32>
    %156 = math.exp %155 : vector<8x128xf32>
    %cst_52 = arith.constant 1.000000e+00 : f32
    %157 = vector.broadcast %cst_52 : f32 to vector<8x128xf32>
    %158 = arith.addf %157, %156 : vector<8x128xf32>
    %159 = arith.divf %157, %158 : vector<8x128xf32>
    %160 = vector.extract_strided_slice %153 {offsets = [0, 128], sizes = [8, 128], strides = [1, 1]} : vector<8x512xf32> to vector<8x128xf32>
    %161 = arith.negf %160 : vector<8x128xf32>
    %162 = math.exp %161 : vector<8x128xf32>
    %cst_53 = arith.constant 1.000000e+00 : f32
    %163 = vector.broadcast %cst_53 : f32 to vector<8x128xf32>
    %164 = arith.addf %163, %162 : vector<8x128xf32>
    %165 = arith.divf %163, %164 : vector<8x128xf32>
    %166 = vector.extract_strided_slice %153 {offsets = [0, 256], sizes = [8, 128], strides = [1, 1]} : vector<8x512xf32> to vector<8x128xf32>
    %167 = math.tanh %166 : vector<8x128xf32>
    %168 = vector.extract_strided_slice %153 {offsets = [0, 384], sizes = [8, 128], strides = [1, 1]} : vector<8x512xf32> to vector<8x128xf32>
    %169 = arith.negf %168 : vector<8x128xf32>
    %170 = math.exp %169 : vector<8x128xf32>
    %cst_54 = arith.constant 1.000000e+00 : f32
    %171 = vector.broadcast %cst_54 : f32 to vector<8x128xf32>
    %172 = arith.addf %171, %170 : vector<8x128xf32>
    %173 = arith.divf %171, %172 : vector<8x128xf32>
    %174 = arith.mulf %165, %141 : vector<8x128xf32>
    %175 = arith.mulf %159, %167 : vector<8x128xf32>
    %176 = arith.addf %174, %175 : vector<8x128xf32>
    %177 = math.tanh %176 : vector<8x128xf32>
    %178 = arith.mulf %173, %177 : vector<8x128xf32>
    %179 = arith.index_cast %c4_i32 : i32 to index
    %c0_55 = arith.constant 0 : index
    %c0_56 = arith.constant 0 : index
    %180 = vector.load %arg5[%179, %c0_55, %c0_56] : memref<8x8x128xf32, #tpu.memory_space<vmem>>, vector<1x8x128xf32>
    %181 = vector.shape_cast %180 : vector<1x8x128xf32> to vector<8x128xf32>
    %182 = vector.shape_cast %178 : vector<8x128xf32> to vector<1x8x128xf32>
    tpu.vector_store %arg5[%179, %c0_55, %c0_56], %182 {strides = array<i32>} : memref<8x8x128xf32, #tpu.memory_space<vmem>>, vector<1x8x128xf32>,
    %c5_i32 = arith.constant 5 : i32
    %c8_i32_57 = arith.constant 8 : i32
    %183 = arith.muli %c5_i32, %c8_i32_57 : i32
    %184 = arith.index_cast %183 : i32 to index
    %c0_58 = arith.constant 0 : index
    %185 = vector.load %arg6[%184, %c0_58] : memref<64x512xf32, #tpu.memory_space<vmem>>, vector<8x512xf32>
    %c0_59 = arith.constant 0 : index
    %c0_60 = arith.constant 0 : index
    %186 = vector.load %arg3[%c0_59, %c0_60] : memref<128x512xf32, #tpu.memory_space<vmem>>, vector<128x512xf32>
    %cst_61 = arith.constant dense<0.000000e+00> : vector<8x512xf32>
    %187 = tpu.matmul %178, %186, %cst_61 {dimension_numbers = #tpu.dot_dimension_numbers<[1], [0], [0], [1], [0, 0, 1, 1], [], []>} : vector<8x128xf32>, vector<128x512xf32>, vector<8x512xf32> -> vector<8x512xf32>
    %188 = arith.addf %185, %187 : vector<8x512xf32>
    %189 = vector.extract_strided_slice %188 {offsets = [0, 0], sizes = [8, 128], strides = [1, 1]} : vector<8x512xf32> to vector<8x128xf32>
    %190 = arith.negf %189 : vector<8x128xf32>
    %191 = math.exp %190 : vector<8x128xf32>
    %cst_62 = arith.constant 1.000000e+00 : f32
    %192 = vector.broadcast %cst_62 : f32 to vector<8x128xf32>
    %193 = arith.addf %192, %191 : vector<8x128xf32>
    %194 = arith.divf %192, %193 : vector<8x128xf32>
    %195 = vector.extract_strided_slice %188 {offsets = [0, 128], sizes = [8, 128], strides = [1, 1]} : vector<8x512xf32> to vector<8x128xf32>
    %196 = arith.negf %195 : vector<8x128xf32>
    %197 = math.exp %196 : vector<8x128xf32>
    %cst_63 = arith.constant 1.000000e+00 : f32
    %198 = vector.broadcast %cst_63 : f32 to vector<8x128xf32>
    %199 = arith.addf %198, %197 : vector<8x128xf32>
    %200 = arith.divf %198, %199 : vector<8x128xf32>
    %201 = vector.extract_strided_slice %188 {offsets = [0, 256], sizes = [8, 128], strides = [1, 1]} : vector<8x512xf32> to vector<8x128xf32>
    %202 = math.tanh %201 : vector<8x128xf32>
    %203 = vector.extract_strided_slice %188 {offsets = [0, 384], sizes = [8, 128], strides = [1, 1]} : vector<8x512xf32> to vector<8x128xf32>
    %204 = arith.negf %203 : vector<8x128xf32>
    %205 = math.exp %204 : vector<8x128xf32>
    %cst_64 = arith.constant 1.000000e+00 : f32
    %206 = vector.broadcast %cst_64 : f32 to vector<8x128xf32>
    %207 = arith.addf %206, %205 : vector<8x128xf32>
    %208 = arith.divf %206, %207 : vector<8x128xf32>
    %209 = arith.mulf %200, %176 : vector<8x128xf32>
    %210 = arith.mulf %194, %202 : vector<8x128xf32>
    %211 = arith.addf %209, %210 : vector<8x128xf32>
    %212 = math.tanh %211 : vector<8x128xf32>
    %213 = arith.mulf %208, %212 : vector<8x128xf32>
    %214 = arith.index_cast %c5_i32 : i32 to index
    %c0_65 = arith.constant 0 : index
    %c0_66 = arith.constant 0 : index
    %215 = vector.load %arg5[%214, %c0_65, %c0_66] : memref<8x8x128xf32, #tpu.memory_space<vmem>>, vector<1x8x128xf32>
    %216 = vector.shape_cast %215 : vector<1x8x128xf32> to vector<8x128xf32>
    %217 = vector.shape_cast %213 : vector<8x128xf32> to vector<1x8x128xf32>
    tpu.vector_store %arg5[%214, %c0_65, %c0_66], %217 {strides = array<i32>} : memref<8x8x128xf32, #tpu.memory_space<vmem>>, vector<1x8x128xf32>,
    %c6_i32 = arith.constant 6 : i32
    %c8_i32_67 = arith.constant 8 : i32
    %218 = arith.muli %c6_i32, %c8_i32_67 : i32
    %219 = arith.index_cast %218 : i32 to index
    %c0_68 = arith.constant 0 : index
    %220 = vector.load %arg6[%219, %c0_68] : memref<64x512xf32, #tpu.memory_space<vmem>>, vector<8x512xf32>
    %c0_69 = arith.constant 0 : index
    %c0_70 = arith.constant 0 : index
    %221 = vector.load %arg3[%c0_69, %c0_70] : memref<128x512xf32, #tpu.memory_space<vmem>>, vector<128x512xf32>
    %cst_71 = arith.constant dense<0.000000e+00> : vector<8x512xf32>
    %222 = tpu.matmul %213, %221, %cst_71 {dimension_numbers = #tpu.dot_dimension_numbers<[1], [0], [0], [1], [0, 0, 1, 1], [], []>} : vector<8x128xf32>, vector<128x512xf32>, vector<8x512xf32> -> vector<8x512xf32>
    %223 = arith.addf %220, %222 : vector<8x512xf32>
    %224 = vector.extract_strided_slice %223 {offsets = [0, 0], sizes = [8, 128], strides = [1, 1]} : vector<8x512xf32> to vector<8x128xf32>
    %225 = arith.negf %224 : vector<8x128xf32>
    %226 = math.exp %225 : vector<8x128xf32>
    %cst_72 = arith.constant 1.000000e+00 : f32
    %227 = vector.broadcast %cst_72 : f32 to vector<8x128xf32>
    %228 = arith.addf %227, %226 : vector<8x128xf32>
    %229 = arith.divf %227, %228 : vector<8x128xf32>
    %230 = vector.extract_strided_slice %223 {offsets = [0, 128], sizes = [8, 128], strides = [1, 1]} : vector<8x512xf32> to vector<8x128xf32>
    %231 = arith.negf %230 : vector<8x128xf32>
    %232 = math.exp %231 : vector<8x128xf32>
    %cst_73 = arith.constant 1.000000e+00 : f32
    %233 = vector.broadcast %cst_73 : f32 to vector<8x128xf32>
    %234 = arith.addf %233, %232 : vector<8x128xf32>
    %235 = arith.divf %233, %234 : vector<8x128xf32>
    %236 = vector.extract_strided_slice %223 {offsets = [0, 256], sizes = [8, 128], strides = [1, 1]} : vector<8x512xf32> to vector<8x128xf32>
    %237 = math.tanh %236 : vector<8x128xf32>
    %238 = vector.extract_strided_slice %223 {offsets = [0, 384], sizes = [8, 128], strides = [1, 1]} : vector<8x512xf32> to vector<8x128xf32>
    %239 = arith.negf %238 : vector<8x128xf32>
    %240 = math.exp %239 : vector<8x128xf32>
    %cst_74 = arith.constant 1.000000e+00 : f32
    %241 = vector.broadcast %cst_74 : f32 to vector<8x128xf32>
    %242 = arith.addf %241, %240 : vector<8x128xf32>
    %243 = arith.divf %241, %242 : vector<8x128xf32>
    %244 = arith.mulf %235, %211 : vector<8x128xf32>
    %245 = arith.mulf %229, %237 : vector<8x128xf32>
    %246 = arith.addf %244, %245 : vector<8x128xf32>
    %247 = math.tanh %246 : vector<8x128xf32>
    %248 = arith.mulf %243, %247 : vector<8x128xf32>
    %249 = arith.index_cast %c6_i32 : i32 to index
    %c0_75 = arith.constant 0 : index
    %c0_76 = arith.constant 0 : index
    %250 = vector.load %arg5[%249, %c0_75, %c0_76] : memref<8x8x128xf32, #tpu.memory_space<vmem>>, vector<1x8x128xf32>
    %251 = vector.shape_cast %250 : vector<1x8x128xf32> to vector<8x128xf32>
    %252 = vector.shape_cast %248 : vector<8x128xf32> to vector<1x8x128xf32>
    tpu.vector_store %arg5[%249, %c0_75, %c0_76], %252 {strides = array<i32>} : memref<8x8x128xf32, #tpu.memory_space<vmem>>, vector<1x8x128xf32>,
    %c7_i32 = arith.constant 7 : i32
    %c8_i32_77 = arith.constant 8 : i32
    %253 = arith.muli %c7_i32, %c8_i32_77 : i32
    %254 = arith.index_cast %253 : i32 to index
    %c0_78 = arith.constant 0 : index
    %255 = vector.load %arg6[%254, %c0_78] : memref<64x512xf32, #tpu.memory_space<vmem>>, vector<8x512xf32>
    %c0_79 = arith.constant 0 : index
    %c0_80 = arith.constant 0 : index
    %256 = vector.load %arg3[%c0_79, %c0_80] : memref<128x512xf32, #tpu.memory_space<vmem>>, vector<128x512xf32>
    %cst_81 = arith.constant dense<0.000000e+00> : vector<8x512xf32>
    %257 = tpu.matmul %248, %256, %cst_81 {dimension_numbers = #tpu.dot_dimension_numbers<[1], [0], [0], [1], [0, 0, 1, 1], [], []>} : vector<8x128xf32>, vector<128x512xf32>, vector<8x512xf32> -> vector<8x512xf32>
    %258 = arith.addf %255, %257 : vector<8x512xf32>
    %259 = vector.extract_strided_slice %258 {offsets = [0, 0], sizes = [8, 128], strides = [1, 1]} : vector<8x512xf32> to vector<8x128xf32>
    %260 = arith.negf %259 : vector<8x128xf32>
    %261 = math.exp %260 : vector<8x128xf32>
    %cst_82 = arith.constant 1.000000e+00 : f32
    %262 = vector.broadcast %cst_82 : f32 to vector<8x128xf32>
    %263 = arith.addf %262, %261 : vector<8x128xf32>
    %264 = arith.divf %262, %263 : vector<8x128xf32>
    %265 = vector.extract_strided_slice %258 {offsets = [0, 128], sizes = [8, 128], strides = [1, 1]} : vector<8x512xf32> to vector<8x128xf32>
    %266 = arith.negf %265 : vector<8x128xf32>
    %267 = math.exp %266 : vector<8x128xf32>
    %cst_83 = arith.constant 1.000000e+00 : f32
    %268 = vector.broadcast %cst_83 : f32 to vector<8x128xf32>
    %269 = arith.addf %268, %267 : vector<8x128xf32>
    %270 = arith.divf %268, %269 : vector<8x128xf32>
    %271 = vector.extract_strided_slice %258 {offsets = [0, 256], sizes = [8, 128], strides = [1, 1]} : vector<8x512xf32> to vector<8x128xf32>
    %272 = math.tanh %271 : vector<8x128xf32>
    %273 = vector.extract_strided_slice %258 {offsets = [0, 384], sizes = [8, 128], strides = [1, 1]} : vector<8x512xf32> to vector<8x128xf32>
    %274 = arith.negf %273 : vector<8x128xf32>
    %275 = math.exp %274 : vector<8x128xf32>
    %cst_84 = arith.constant 1.000000e+00 : f32
    %276 = vector.broadcast %cst_84 : f32 to vector<8x128xf32>
    %277 = arith.addf %276, %275 : vector<8x128xf32>
    %278 = arith.divf %276, %277 : vector<8x128xf32>
    %279 = arith.mulf %270, %246 : vector<8x128xf32>
    %280 = arith.mulf %264, %272 : vector<8x128xf32>
    %281 = arith.addf %279, %280 : vector<8x128xf32>
    %282 = math.tanh %281 : vector<8x128xf32>
    %283 = arith.mulf %278, %282 : vector<8x128xf32>
    %284 = arith.index_cast %c7_i32 : i32 to index
    %c0_85 = arith.constant 0 : index
    %c0_86 = arith.constant 0 : index
    %285 = vector.load %arg5[%284, %c0_85, %c0_86] : memref<8x8x128xf32, #tpu.memory_space<vmem>>, vector<1x8x128xf32>
    %286 = vector.shape_cast %285 : vector<1x8x128xf32> to vector<8x128xf32>
    %287 = vector.shape_cast %283 : vector<8x128xf32> to vector<1x8x128xf32>
    tpu.vector_store %arg5[%284, %c0_85, %c0_86], %287 {strides = array<i32>} : memref<8x8x128xf32, #tpu.memory_space<vmem>>, vector<1x8x128xf32>,
    %c8_i32_87 = arith.constant 8 : i32
    return
  }
  func.func @transform_0(%arg0: i32) -> (i32, i32) {
    %c0_i32 = arith.constant 0 : i32
    %c0_i32_0 = arith.constant 0 : i32
    %c0_i32_1 = arith.constant 0 : i32
    return %c0_i32, %c0_i32_0 : i32, i32
  }
  func.func @transform_1(%arg0: i32) -> (i32, i32) {
    %c0_i32 = arith.constant 0 : i32
    %c0_i32_0 = arith.constant 0 : i32
    %c0_i32_1 = arith.constant 0 : i32
    return %c0_i32, %c0_i32_0 : i32, i32
  }
  func.func @transform_2(%arg0: i32) -> (i32, i32) {
    %c0_i32 = arith.constant 0 : i32
    %c0_i32_0 = arith.constant 0 : i32
    %c0_i32_1 = arith.constant 0 : i32
    return %c0_i32, %c0_i32_0 : i32, i32
  }
  func.func @transform_3(%arg0: i32) -> (i32, i32) {
    %c0_i32 = arith.constant 0 : i32
    %c0_i32_0 = arith.constant 0 : i32
    %c0_i32_1 = arith.constant 0 : i32
    return %c0_i32, %c0_i32_0 : i32, i32
  }
  func.func @transform_4(%arg0: i32) -> (i32, i32, i32) {
    %c0_i32 = arith.constant 0 : i32
    %c0_i32_0 = arith.constant 0 : i32
    %c0_i32_1 = arith.constant 0 : i32
    %c0_i32_2 = arith.constant 0 : i32
    return %c0_i32, %c0_i32_0, %c0_i32_1 : i32, i32, i32
  }
}

</mosaic_0001>

<bundles_post_ra>
// kernel: generator_forward.3
= control target key start
LH: loop header
LB: loop body
LE: loop exit
PB: predicated region body
PF: predicated region fallthrough
CT: control target
= control target key end

     0   :  { %s398_s1 = inlined_call_operand.vmem [shape: f32[128,128], index: 1, kind: input, shape index: {}]   ;;  %s399_s0 = inlined_call_operand.vmem [shape: f32[64,128], index: 0, kind: input, shape index: {}]   ;;  %s400_s2 = inlined_call_operand.vmem [shape: f32[1,128], index: 2, kind: input, shape index: {}]   ;;  %s401_s3 = inlined_call_operand.vmem [shape: f32[64,128], index: 3, kind: output, shape index: {}]  }
   0x1   :  { %v22_v0 = vld [vmem:[%s398_s1] sm:$0xff]  ;;  %v23_v1 = vld [vmem:[%s398_s1 + $0x8] sm:$0xff]  ;;  %v24_v2 = vld [vmem:[%s398_s1 + $0x10] sm:$0xff] }
   0x2   :  { %v231_v3 = vpack.c.bf16 %v23_v1, %v22_v0  ;;  %v25_v4 = vld [vmem:[%s398_s1 + $0x18] sm:$0xff]  ;;  %v26_v6 = vld [vmem:[%s398_s1 + $0x20] sm:$0xff]  ;;  %v27_v7 = vld [vmem:[%s398_s1 + $0x28] sm:$0xff] }
   0x3   :  { %v235_v5 = vpack.c.bf16 %v25_v4, %v24_v2  ;;  %v239_v8 = vpack.c.bf16 %v27_v7, %v26_v6  ;;  %v14_v9 = vld [vmem:[%s399_s0] sm:$0xff]  ;;  %v28_v11 = vld [vmem:[%s398_s1 + $0x30] sm:$0xff]  ;;  %v29_v12 = vld [vmem:[%s398_s1 + $0x38] sm:$0xff] }
   0x4   :  { %232 = vmatprep.subr.bf16.mxu0 %v231_v3  ;;  %263 = vmatprep.subr.bf16.mxu1 %v231_v3  ;;  %v18_v10 = vld [vmem:[%s399_s0 + $0x20] sm:$0xff]  ;;  %v243_v13 = vpack.c.bf16 %v29_v12, %v28_v11  ;;  %v31_v15 = vld [vmem:[%s398_s1 + $0x48] sm:$0xff]  ;;  %v32_v17 = vld [vmem:[%s398_s1 + $0x50] sm:$0xff] }
   0x5   :  { %234 = vmatpush3.bf16.msra.mxu0 %v231_v3  ;;  %271 = vmatpush3.bf16.msra.mxu1 %v231_v3  ;;  %v30_v14 = vld [vmem:[%s398_s1 + $0x40] sm:$0xff]  ;;  %v33_v18 = vld [vmem:[%s398_s1 + $0x58] sm:$0xff]  ;;  %v35_v21 = vld [vmem:[%s398_s1 + $0x68] sm:$0xff] }
   0x6   :  { %236 = vmatprep.subr.bf16.mxu0 %v235_v5  ;;  %264 = vmatprep.subr.bf16.mxu1 %v235_v5  ;;  %v247_v16 = vpack.c.bf16 %v31_v15, %v30_v14  ;;  %v251_v19 = vpack.c.bf16 %v33_v18, %v32_v17  ;;  %v34_v20 = vld [vmem:[%s398_s1 + $0x60] sm:$0xff]  ;;  %v36_v23 = vld [vmem:[%s398_s1 + $0x70] sm:$0xff]  ;;  %v37_v24 = vld [vmem:[%s398_s1 + $0x78] sm:$0xff] }
   0x7   :  { %219 = vmatprep.mubr.f32.mxu0 %v14_v9  ;;  %225 = vmatprep.mubr.f32.mxu1 %v18_v10  ;;  %v255_v22 = vpack.c.bf16 %v35_v21, %v34_v20  ;;  %v259_v25 = vpack.c.bf16 %v37_v24, %v36_v23  ;;  %v15_v26 = vld [vmem:[%s399_s0 + $0x8] sm:$0xff]  ;;  %v16_v28 = vld [vmem:[%s399_s0 + $0x10] sm:$0xff]  ;;  %v17_v30 = vld [vmem:[%s399_s0 + $0x18] sm:$0xff] }
   0x8   :  { %v19_v27 = vld [vmem:[%s399_s0 + $0x28] sm:$0xff]  ;;  %v20_v29 = vld [vmem:[%s399_s0 + $0x30] sm:$0xff]  ;;  %v21_v31 = vld [vmem:[%s399_s0 + $0x38] sm:$0xff] }
   0x9   :  { %238 = vmatpush3.bf16.msra.mxu0 %v235_v5  ;;  %272 = vmatpush3.bf16.msra.mxu1 %v235_v5  ;;  %v162_v32 = vld [vmem:[%s400_s2] ss:$0 sm:$0xff] }
   0xa   :  { %240 = vmatprep.subr.bf16.mxu0 %v239_v8  ;;  %265 = vmatprep.subr.bf16.mxu1 %v239_v8 }
   0xd   :  { %242 = vmatpush3.bf16.msra.mxu0 %v239_v8  ;;  %273 = vmatpush3.bf16.msra.mxu1 %v239_v8 }
   0xe   :  { %244 = vmatprep.subr.bf16.mxu0 %v243_v13  ;;  %266 = vmatprep.subr.bf16.mxu1 %v243_v13 }
  0x11   :  { %246 = vmatpush3.bf16.msra.mxu0 %v243_v13  ;;  %274 = vmatpush3.bf16.msra.mxu1 %v243_v13 }
  0x12   :  { %248 = vmatprep.subr.bf16.mxu0 %v247_v16  ;;  %267 = vmatprep.subr.bf16.mxu1 %v247_v16 }
  0x15   :  { %250 = vmatpush3.bf16.msra.mxu0 %v247_v16  ;;  %275 = vmatpush3.bf16.msra.mxu1 %v247_v16 }
  0x16   :  { %252 = vmatprep.subr.bf16.mxu0 %v251_v19  ;;  %268 = vmatprep.subr.bf16.mxu1 %v251_v19 }
  0x19   :  { %254 = vmatpush3.bf16.msra.mxu0 %v251_v19  ;;  %276 = vmatpush3.bf16.msra.mxu1 %v251_v19 }
  0x1a   :  { %256 = vmatprep.subr.bf16.mxu0 %v255_v22  ;;  %269 = vmatprep.subr.bf16.mxu1 %v255_v22 }
  0x1d   :  { %258 = vmatpush3.bf16.msra.mxu0 %v255_v22  ;;  %277 = vmatpush3.bf16.msra.mxu1 %v255_v22 }
  0x1e   :  { %260 = vmatprep.subr.bf16.mxu0 %v259_v25  ;;  %270 = vmatprep.subr.bf16.mxu1 %v259_v25 }
  0x21   :  { %262 = vmatpush3.bf16.msra.mxu0 %v259_v25  ;;  %278 = vmatpush3.bf16.msra.mxu1 %v259_v25 }
  0x24   :  { %220 = vmatmul.mubr.f32.vlgmr.msra.gmra.mrb[0].mxu0 %v15_v26  ;;  %226 = vmatmul.mubr.f32.vlgmr.msra.gmra.mrb[0].mxu1 %v19_v27 }
  0x25   :  { %222 = vmatprep.mubr.f32.mxu0 %v16_v28  ;;  %228 = vmatprep.mubr.f32.mxu1 %v20_v29 }
  0x28   :  { %223 = vmatmul.mubr.f32.gmra.mrb[2].mxu0 %v17_v30  ;;  %229 = vmatmul.mubr.f32.gmra.mrb[2].mxu1 %v21_v31 }
  0xf7   :  { %v221_v33 = vpop.f32.mrb[0].mxu0  ;;  %v227_v34 = vpop.f32.mrb[0].mxu1 }
  0xf8   :  { %v117_v35 = vadd.f32 %v221_v33, %v162_v32  ;;  %v137_v36 = vadd.f32 %v227_v34, %v162_v32  ;;  %v111_v37 = vpop.f32.mrb[1].mxu0  ;;  %v131_v38 = vpop.f32.mrb[1].mxu1 }
  0xf9   :  { %v112_v39 = vadd.f32 %v162_v32, %v111_v37  ;;  %v132_v40 = vadd.f32 %v162_v32, %v131_v38 }
  0xfa   :  { %151 = vst [vmem:[%s401_s3 + $0x8] sm:$0xff] %v117_v35  ;;  %155 = vst [vmem:[%s401_s3 + $0x28] sm:$0xff] %v137_v36 }
  0xfb   :  { %150 = vst [vmem:[%s401_s3] sm:$0xff] %v112_v39  ;;  %154 = vst [vmem:[%s401_s3 + $0x20] sm:$0xff] %v132_v40  ;;  %v224_v41 = vpop.f32.mrb[2].mxu0  ;;  %v230_v42 = vpop.f32.mrb[2].mxu1 }
  0xfc   :  { %v127_v43 = vadd.f32 %v224_v41, %v162_v32  ;;  %v147_v44 = vadd.f32 %v230_v42, %v162_v32  ;;  %v121_v45 = vpop.f32.mrb[3].mxu0  ;;  %v141_v46 = vpop.f32.mrb[3].mxu1 }
  0xfd   :  { %v122_v47 = vadd.f32 %v162_v32, %v121_v45  ;;  %v142_v48 = vadd.f32 %v162_v32, %v141_v46 }
  0xfe   :  { %153 = vst [vmem:[%s401_s3 + $0x18] sm:$0xff] %v127_v43  ;;  %157 = vst [vmem:[%s401_s3 + $0x38] sm:$0xff] %v147_v44 }
  0xff   :  { %152 = vst [vmem:[%s401_s3 + $0x10] sm:$0xff] %v122_v47  ;;  %156 = vst [vmem:[%s401_s3 + $0x30] sm:$0xff] %v142_v48 }

// kernel: generator_forward.2
= control target key start
LH: loop header
LB: loop body
LE: loop exit
PB: predicated region body
PF: predicated region fallthrough
CT: control target
= control target key end

     0   :  { %v3092_v3 = vmov 0.0   ;;  %s4267_s1 = inlined_call_operand.vmem [shape: f32[128,512], index: 1, kind: input, shape index: {}]   ;;  %s4268_s2 = inlined_call_operand.vmem [shape: f32[128,512], index: 2, kind: input, shape index: {}]   ;;  %s4269_s0 = inlined_call_operand.vmem [shape: f32[64,128], index: 0, kind: input, shape index: {}]   ;;  %s4270_s3 = inlined_call_operand.vmem [shape: f32[1,512], index: 3, kind: input, shape index: {}]   ;;  %s4271_s4 = inlined_call_operand.vmem [shape: f32[8,8,128], index: 4, kind: output, shape index: {}]  }
   0x1   :  { %v26_v0 = vld [vmem:[%s4267_s1 + $0x8] sm:$0xff]  ;;  %v28_v2 = vld [vmem:[%s4267_s1 + $0x18] sm:$0xff]  ;;  %175 = vmatprep.mubr.f32.mxu0 %v3092_v3  ;;  %288 = vmatprep.mubr.f32.mxu1 %v3092_v3  ;;  %v25_v6 = vld [vmem:[%s4267_s1] sm:$0xff] }
   0x2   :  { %v30_v1 = vld [vmem:[%s4267_s1 + $0x28] sm:$0xff]  ;;  %v32_v5 = vld [vmem:[%s4267_s1 + $0x38] sm:$0xff]  ;;  %v29_v7 = vld [vmem:[%s4267_s1 + $0x20] sm:$0xff] }
   0x3   :  { %v2323_v4 = vpack.c.bf16 %v30_v1, %v26_v0  ;;  %v2355_v8 = vpack.c.bf16 %v32_v5, %v28_v2  ;;  %v2325_v9 = vpack.c.bf16 %v29_v7, %v25_v6  ;;  %v27_v10 = vld [vmem:[%s4267_s1 + $0x10] sm:$0xff]  ;;  %v34_v12 = vld [vmem:[%s4267_s1 + $0x48] sm:$0xff]  ;;  %v36_v15 = vld [vmem:[%s4267_s1 + $0x58] sm:$0xff] }
   0x4   :  { %v31_v11 = vld [vmem:[%s4267_s1 + $0x30] sm:$0xff]  ;;  %v38_v14 = vld [vmem:[%s4267_s1 + $0x68] sm:$0xff]  ;;  %v40_v16 = vld [vmem:[%s4267_s1 + $0x78] sm:$0xff] }
   0x5   :  { %2324 = vmatprep.subr.bf16.mxu0 %v2323_v4  ;;  %v2357_v13 = vpack.c.bf16 %v31_v11, %v27_v10  ;;  %2356 = vmatprep.subr.bf16.mxu1 %v2355_v8  ;;  %v2327_v17 = vpack.c.bf16 %v38_v14, %v34_v12  ;;  %v2359_v18 = vpack.c.bf16 %v40_v16, %v36_v15  ;;  %v33_v19 = vld [vmem:[%s4267_s1 + $0x40] sm:$0xff]  ;;  %v35_v21 = vld [vmem:[%s4267_s1 + $0x50] sm:$0xff]  ;;  %v42_v24 = vld [vmem:[%s4267_s1 + $0x88] sm:$0xff] }
   0x6   :  { %2326 = vmatpush1.bf16.msra.mxu0 %v2325_v9  ;;  %v37_v20 = vld [vmem:[%s4267_s1 + $0x60] sm:$0xff]  ;;  %v39_v23 = vld [vmem:[%s4267_s1 + $0x70] sm:$0xff]  ;;  %v46_v25 = vld [vmem:[%s4267_s1 + $0xa8] sm:$0xff] }
   0x7   :  { %2358 = vmatpush1.bf16.msra.mxu1 %v2357_v13  ;;  %v2329_v22 = vpack.c.bf16 %v37_v20, %v33_v19  ;;  %2328 = vmatprep.subr.bf16.mxu0 %v2327_v17  ;;  %v2361_v26 = vpack.c.bf16 %v39_v23, %v35_v21  ;;  %v2331_v27 = vpack.c.bf16 %v46_v25, %v42_v24  ;;  %v44_v28 = vld [vmem:[%s4267_s1 + $0x98] sm:$0xff]  ;;  %v41_v30 = vld [vmem:[%s4267_s1 + $0x80] sm:$0xff]  ;;  %v43_v33 = vld [vmem:[%s4267_s1 + $0x90] sm:$0xff] }
   0x8   :  { %2360 = vmatprep.subr.bf16.mxu1 %v2359_v18  ;;  %v48_v29 = vld [vmem:[%s4267_s1 + $0xb8] sm:$0xff]  ;;  %v45_v32 = vld [vmem:[%s4267_s1 + $0xa0] sm:$0xff]  ;;  %v47_v34 = vld [vmem:[%s4267_s1 + $0xb0] sm:$0xff] }
   0x9   :  { %v2363_v31 = vpack.c.bf16 %v48_v29, %v44_v28  ;;  %v2333_v35 = vpack.c.bf16 %v45_v32, %v41_v30  ;;  %v50_v36 = vld [vmem:[%s4267_s1 + $0xc8] sm:$0xff]  ;;  %v52_v38 = vld [vmem:[%s4267_s1 + $0xd8] sm:$0xff]  ;;  %v2365_v39 = vpack.c.bf16 %v47_v34, %v43_v33  ;;  %v49_v42 = vld [vmem:[%s4267_s1 + $0xc0] sm:$0xff] }
   0xa   :  { %2330 = vmatpush1.bf16.msra.mxu0 %v2329_v22  ;;  %v54_v37 = vld [vmem:[%s4267_s1 + $0xe8] sm:$0xff]  ;;  %v56_v41 = vld [vmem:[%s4267_s1 + $0xf8] sm:$0xff]  ;;  %v53_v43 = vld [vmem:[%s4267_s1 + $0xe0] sm:$0xff] }
   0xb   :  { %2362 = vmatpush1.bf16.msra.mxu1 %v2361_v26  ;;  %2332 = vmatprep.subr.bf16.mxu0 %v2331_v27  ;;  %v2335_v40 = vpack.c.bf16 %v54_v37, %v50_v36  ;;  %v2367_v44 = vpack.c.bf16 %v56_v41, %v52_v38  ;;  %v51_v45 = vld [vmem:[%s4267_s1 + $0xd0] sm:$0xff]  ;;  %v58_v47 = vld [vmem:[%s4267_s1 + $0x108] sm:$0xff]  ;;  %v60_v49 = vld [vmem:[%s4267_s1 + $0x118] sm:$0xff]  ;;  %v2337_v51 = vpack.c.bf16 %v53_v43, %v49_v42 }
   0xc   :  { %2364 = vmatprep.subr.bf16.mxu1 %v2363_v31  ;;  %v55_v46 = vld [vmem:[%s4267_s1 + $0xf0] sm:$0xff]  ;;  %v62_v48 = vld [vmem:[%s4267_s1 + $0x128] sm:$0xff]  ;;  %v64_v50 = vld [vmem:[%s4267_s1 + $0x138] sm:$0xff] }
   0xd   :  { %v2369_v52 = vpack.c.bf16 %v55_v46, %v51_v45  ;;  %v2339_v53 = vpack.c.bf16 %v62_v48, %v58_v47  ;;  %v57_v54 = vld [vmem:[%s4267_s1 + $0x100] sm:$0xff]  ;;  %v59_v56 = vld [vmem:[%s4267_s1 + $0x110] sm:$0xff]  ;;  %v2371_v57 = vpack.c.bf16 %v64_v50, %v60_v49  ;;  %v66_v59 = vld [vmem:[%s4267_s1 + $0x148] sm:$0xff] }
   0xe   :  { %2334 = vmatpush1.bf16.msra.mxu0 %v2333_v35  ;;  %v61_v55 = vld [vmem:[%s4267_s1 + $0x120] sm:$0xff]  ;;  %v63_v58 = vld [vmem:[%s4267_s1 + $0x130] sm:$0xff]  ;;  %v70_v60 = vld [vmem:[%s4267_s1 + $0x168] sm:$0xff] }
   0xf   :  { %2366 = vmatpush1.bf16.msra.mxu1 %v2365_v39  ;;  %2336 = vmatprep.subr.bf16.mxu0 %v2335_v40  ;;  %v68_v61 = vld [vmem:[%s4267_s1 + $0x158] sm:$0xff]  ;;  %v2341_v63 = vpack.c.bf16 %v61_v55, %v57_v54  ;;  %v2373_v0 = vpack.c.bf16 %v63_v58, %v59_v56  ;;  %v2343_v1 = vpack.c.bf16 %v70_v60, %v66_v59  ;;  %v65_v2 = vld [vmem:[%s4267_s1 + $0x140] sm:$0xff]  ;;  %v67_v5 = vld [vmem:[%s4267_s1 + $0x150] sm:$0xff] }
  0x10   :  { %2368 = vmatprep.subr.bf16.mxu1 %v2367_v44  ;;  %v72_v62 = vld [vmem:[%s4267_s1 + $0x178] sm:$0xff]  ;;  %v69_v4 = vld [vmem:[%s4267_s1 + $0x160] sm:$0xff]  ;;  %v71_v7 = vld [vmem:[%s4267_s1 + $0x170] sm:$0xff] }
  0x11   :  { %v2375_v6 = vpack.c.bf16 %v72_v62, %v68_v61  ;;  %v74_v8 = vld [vmem:[%s4267_s1 + $0x188] sm:$0xff]  ;;  %v76_v10 = vld [vmem:[%s4267_s1 + $0x198] sm:$0xff]  ;;  %v2345_v12 = vpack.c.bf16 %v69_v4, %v65_v2  ;;  %v2377_v13 = vpack.c.bf16 %v71_v7, %v67_v5  ;;  %v73_v15 = vld [vmem:[%s4267_s1 + $0x180] sm:$0xff] }
  0x12   :  { %2338 = vmatpush1.bf16.msra.mxu0 %v2337_v51  ;;  %v78_v9 = vld [vmem:[%s4267_s1 + $0x1a8] sm:$0xff]  ;;  %v80_v11 = vld [vmem:[%s4267_s1 + $0x1b8] sm:$0xff]  ;;  %v77_v16 = vld [vmem:[%s4267_s1 + $0x1a0] sm:$0xff] }
  0x13   :  { %2370 = vmatpush1.bf16.msra.mxu1 %v2369_v52  ;;  %2340 = vmatprep.subr.bf16.mxu0 %v2339_v53  ;;  %v2347_v14 = vpack.c.bf16 %v78_v9, %v74_v8  ;;  %v75_v17 = vld [vmem:[%s4267_s1 + $0x190] sm:$0xff]  ;;  %v2379_v18 = vpack.c.bf16 %v80_v11, %v76_v10  ;;  %v82_v20 = vld [vmem:[%s4267_s1 + $0x1c8] sm:$0xff]  ;;  %v84_v22 = vld [vmem:[%s4267_s1 + $0x1d8] sm:$0xff]  ;;  %v2349_v24 = vpack.c.bf16 %v77_v16, %v73_v15 }
  0x14   :  { %2372 = vmatprep.subr.bf16.mxu1 %v2371_v57  ;;  %v79_v19 = vld [vmem:[%s4267_s1 + $0x1b0] sm:$0xff]  ;;  %v86_v21 = vld [vmem:[%s4267_s1 + $0x1e8] sm:$0xff]  ;;  %v88_v23 = vld [vmem:[%s4267_s1 + $0x1f8] sm:$0xff] }
  0x15   :  { %v2381_v25 = vpack.c.bf16 %v79_v19, %v75_v17  ;;  %v2351_v26 = vpack.c.bf16 %v86_v21, %v82_v20  ;;  %v81_v27 = vld [vmem:[%s4267_s1 + $0x1c0] sm:$0xff]  ;;  %v83_v29 = vld [vmem:[%s4267_s1 + $0x1d0] sm:$0xff]  ;;  %v2383_v30 = vpack.c.bf16 %v88_v23, %v84_v22  ;;  %v374_v32 = vld [vmem:[%s4268_s2 + $0x8] sm:$0xff] }
  0x16   :  { %2342 = vmatpush1.bf16.msra.mxu0 %v2341_v63  ;;  %v85_v28 = vld [vmem:[%s4267_s1 + $0x1e0] sm:$0xff]  ;;  %v87_v31 = vld [vmem:[%s4267_s1 + $0x1f0] sm:$0xff]  ;;  %v378_v33 = vld [vmem:[%s4268_s2 + $0x28] sm:$0xff] }
  0x17   :  { %2374 = vmatpush1.bf16.msra.mxu1 %v2373_v0  ;;  %2344 = vmatprep.subr.bf16.mxu0 %v2343_v1  ;;  %v376_v34 = vld [vmem:[%s4268_s2 + $0x18] sm:$0xff]  ;;  %v2353_v36 = vpack.c.bf16 %v85_v28, %v81_v27  ;;  %v2385_v37 = vpack.c.bf16 %v87_v31, %v83_v29  ;;  %v3324_v38 = vpack.c.bf16 %v378_v33, %v374_v32  ;;  %v373_v39 = vld [vmem:[%s4268_s2] sm:$0xff]  ;;  %v375_v42 = vld [vmem:[%s4268_s2 + $0x10] sm:$0xff] }
  0x18   :  { %2376 = vmatprep.subr.bf16.mxu1 %v2375_v6  ;;  %v380_v35 = vld [vmem:[%s4268_s2 + $0x38] sm:$0xff]  ;;  %v377_v40 = vld [vmem:[%s4268_s2 + $0x20] sm:$0xff]  ;;  %v379_v43 = vld [vmem:[%s4268_s2 + $0x30] sm:$0xff] }
  0x19   :  { %v3332_v41 = vpack.c.bf16 %v380_v35, %v376_v34  ;;  %v382_v44 = vld [vmem:[%s4268_s2 + $0x48] sm:$0xff]  ;;  %v17_v46 = vld [vmem:[%s4269_s0] sm:$0xff]  ;;  %v3349_v47 = vpack.c.bf16 %v377_v40, %v373_v39  ;;  %v384_v48 = vld [vmem:[%s4268_s2 + $0x58] sm:$0xff]  ;;  %v3358_v50 = vpack.c.bf16 %v379_v43, %v375_v42 }
  0x1a   :  { %2346 = vmatpush1.bf16.msra.mxu0 %v2345_v12  ;;  %v386_v45 = vld [vmem:[%s4268_s2 + $0x68] sm:$0xff]  ;;  %v388_v49 = vld [vmem:[%s4268_s2 + $0x78] sm:$0xff]  ;;  %v381_v51 = vld [vmem:[%s4268_s2 + $0x40] sm:$0xff] }
  0x1b   :  { %2378 = vmatpush1.bf16.msra.mxu1 %v2377_v13  ;;  %2348 = vmatprep.subr.bf16.mxu0 %v2347_v14  ;;  %v385_v52 = vld [vmem:[%s4268_s2 + $0x60] sm:$0xff]  ;;  %v3367_v53 = vpack.c.bf16 %v386_v45, %v382_v44  ;;  %v383_v54 = vld [vmem:[%s4268_s2 + $0x50] sm:$0xff]  ;;  %v3375_v56 = vpack.c.bf16 %v388_v49, %v384_v48  ;;  %v390_v57 = vld [vmem:[%s4268_s2 + $0x88] sm:$0xff] }
  0x1c   :  { %2380 = vmatprep.subr.bf16.mxu1 %v2379_v18  ;;  %v387_v55 = vld [vmem:[%s4268_s2 + $0x70] sm:$0xff]  ;;  %v394_v58 = vld [vmem:[%s4268_s2 + $0xa8] sm:$0xff]  ;;  %v3387_v60 = vpack.c.bf16 %v385_v52, %v381_v51  ;;  %v392_v61 = vld [vmem:[%s4268_s2 + $0x98] sm:$0xff] }
  0x1d   :  { %v18_v59 = vld [vmem:[%s4269_s0 + $0x8] sm:$0xff]  ;;  %v396_v62 = vld [vmem:[%s4268_s2 + $0xb8] sm:$0xff]  ;;  %v3397_v63 = vpack.c.bf16 %v387_v55, %v383_v54  ;;  %v389_v0 = vld [vmem:[%s4268_s2 + $0x80] sm:$0xff]  ;;  %v3407_v2 = vpack.c.bf16 %v394_v58, %v390_v57 }
  0x1e   :  { %2350 = vmatpush1.bf16.msra.mxu0 %v2349_v24  ;;  %v393_v1 = vld [vmem:[%s4268_s2 + $0xa0] sm:$0xff]  ;;  %v391_v4 = vld [vmem:[%s4268_s2 + $0x90] sm:$0xff]  ;;  %v3416_v6 = vpack.c.bf16 %v396_v62, %v392_v61  ;;  %v398_v7 = vld [vmem:[%s4268_s2 + $0xc8] sm:$0xff] }
  0x1f   :  { %2382 = vmatpush1.bf16.msra.mxu1 %v2381_v25  ;;  %2352 = vmatprep.subr.bf16.mxu0 %v2351_v26  ;;  %v395_v5 = vld [vmem:[%s4268_s2 + $0xb0] sm:$0xff]  ;;  %v402_v8 = vld [vmem:[%s4268_s2 + $0xe8] sm:$0xff]  ;;  %v3428_v10 = vpack.c.bf16 %v393_v1, %v389_v0  ;;  %v400_v11 = vld [vmem:[%s4268_s2 + $0xd8] sm:$0xff] }
  0x20   :  { %2384 = vmatprep.subr.bf16.mxu1 %v2383_v30  ;;  %v19_v9 = vld [vmem:[%s4269_s0 + $0x10] sm:$0xff]  ;;  %v404_v12 = vld [vmem:[%s4268_s2 + $0xf8] sm:$0xff]  ;;  %v3438_v13 = vpack.c.bf16 %v395_v5, %v391_v4  ;;  %v397_v14 = vld [vmem:[%s4268_s2 + $0xc0] sm:$0xff]  ;;  %v3448_v16 = vpack.c.bf16 %v402_v8, %v398_v7 }
  0x21   :  { %v401_v15 = vld [vmem:[%s4268_s2 + $0xe0] sm:$0xff]  ;;  %v399_v17 = vld [vmem:[%s4268_s2 + $0xd0] sm:$0xff]  ;;  %v3457_v19 = vpack.c.bf16 %v404_v12, %v400_v11  ;;  %v406_v20 = vld [vmem:[%s4268_s2 + $0x108] sm:$0xff] }
  0x22   :  { %2354 = vmatpush1.bf16.msra.mxu0 %v2353_v36  ;;  %v403_v18 = vld [vmem:[%s4268_s2 + $0xf0] sm:$0xff]  ;;  %v410_v21 = vld [vmem:[%s4268_s2 + $0x128] sm:$0xff]  ;;  %v20_v22 = vld [vmem:[%s4269_s0 + $0x18] sm:$0xff]  ;;  %v3469_v23 = vpack.c.bf16 %v401_v15, %v397_v14 }
  0x23   :  { %2386 = vmatpush1.bf16.msra.mxu1 %v2385_v37  ;;  %2388 = vmatprep.subr.bf16.mxu0 %v3324_v38  ;;  %v408_v24 = vld [vmem:[%s4268_s2 + $0x118] sm:$0xff]  ;;  %v3479_v26 = vpack.c.bf16 %v403_v18, %v399_v17  ;;  %v405_v27 = vld [vmem:[%s4268_s2 + $0x100] sm:$0xff]  ;;  %v3489_v29 = vpack.c.bf16 %v410_v21, %v406_v20  ;;  %v407_v30 = vld [vmem:[%s4268_s2 + $0x110] sm:$0xff] }
  0x24   :  { %2420 = vmatprep.subr.bf16.mxu1 %v3332_v41  ;;  %v412_v25 = vld [vmem:[%s4268_s2 + $0x138] sm:$0xff]  ;;  %v409_v28 = vld [vmem:[%s4268_s2 + $0x120] sm:$0xff]  ;;  %v411_v31 = vld [vmem:[%s4268_s2 + $0x130] sm:$0xff] }
  0x25   :  { %176 = vmatmul.mubr.f32.vlgmr.msra.gmra.mrb[0].mxu0 %v17_v46  ;;  %v3498_v32 = vpack.c.bf16 %v412_v25, %v408_v24  ;;  %v414_v33 = vld [vmem:[%s4268_s2 + $0x148] sm:$0xff]  ;;  %v21_v35 = vld [vmem:[%s4269_s0 + $0x20] sm:$0xff]  ;;  %v3510_v36 = vpack.c.bf16 %v409_v28, %v405_v27  ;;  %v416_v37 = vld [vmem:[%s4268_s2 + $0x158] sm:$0xff]  ;;  %v3520_v40 = vpack.c.bf16 %v411_v31, %v407_v30  ;;  %v91_v28 = vlaneseq }
  0x26   :  { %289 = vmatmul.mubr.f32.vlgmr.msra.gmra.mrb[0].mxu1 %v17_v46  ;;  %2390 = vmatpush1.bf16.msra.mxu0 %v3349_v47  ;;  %v418_v34 = vld [vmem:[%s4268_s2 + $0x168] sm:$0xff]  ;;  %v420_v39 = vld [vmem:[%s4268_s2 + $0x178] sm:$0xff]  ;;  %v413_v42 = vld [vmem:[%s4268_s2 + $0x140] sm:$0xff] }
  0x27   :  { %2422 = vmatpush1.bf16.msra.mxu1 %v3358_v50  ;;  %181 = vmatprep.mubr.f32.mxu0 %v3092_v3  ;;  %v417_v43 = vld [vmem:[%s4268_s2 + $0x160] sm:$0xff]  ;;  %v3530_v44 = vpack.c.bf16 %v418_v34, %v414_v33  ;;  %v415_v45 = vld [vmem:[%s4268_s2 + $0x150] sm:$0xff]  ;;  %v3539_v48 = vpack.c.bf16 %v420_v39, %v416_v37  ;;  %v422_v49 = vld [vmem:[%s4268_s2 + $0x188] sm:$0xff]  ;;  %v92_v30 = vshrl.u32 %v91_v28, 7 }
  0x28   :  { %294 = vmatprep.mubr.f32.mxu1 %v3092_v3  ;;  %2392 = vmatprep.subr.bf16.mxu0 %v3367_v53  ;;  %v419_v46 = vld [vmem:[%s4268_s2 + $0x170] sm:$0xff]  ;;  %v426_v51 = vld [vmem:[%s4268_s2 + $0x1a8] sm:$0xff]  ;;  %v3551_v54 = vpack.c.bf16 %v417_v43, %v413_v42  ;;  %v424_v55 = vld [vmem:[%s4268_s2 + $0x198] sm:$0xff] }
  0x29   :  { %182 = vmatmul.mubr.f32.gmra.mrb[2].mxu0 %v18_v59  ;;  %2424 = vmatprep.subr.bf16.mxu1 %v3375_v56  ;;  %v22_v52 = vld [vmem:[%s4269_s0 + $0x28] sm:$0xff]  ;;  %v428_v57 = vld [vmem:[%s4268_s2 + $0x1b8] sm:$0xff]  ;;  %v3561_v58 = vpack.c.bf16 %v419_v46, %v415_v45  ;;  %v425_v61 = vld [vmem:[%s4268_s2 + $0x1a0] sm:$0xff]  ;;  %v3571_v62 = vpack.c.bf16 %v426_v51, %v422_v49  ;;  %v93_v31 = vsub.s32 0, %v92_v30  ;;  %v97_v34 = vsub.s32 1, %v92_v30 }
  0x2a   :  { %295 = vmatmul.mubr.f32.gmra.mrb[2].mxu1 %v18_v59  ;;  %2394 = vmatpush1.bf16.msra.mxu0 %v3387_v60  ;;  %v421_v59 = vld [vmem:[%s4268_s2 + $0x180] sm:$0xff]  ;;  %v423_v0 = vld [vmem:[%s4268_s2 + $0x190] sm:$0xff]  ;;  %v3580_v4 = vpack.c.bf16 %v428_v57, %v424_v55  ;;  %v430_v5 = vld [vmem:[%s4268_s2 + $0x1c8] sm:$0xff]  ;;  %v105_v42 = vsub.s32 3, %v92_v30  ;;  %v101_v55 = vsub.s32 2, %v92_v30 }
  0x2b   :  { %2426 = vmatpush1.bf16.msra.mxu1 %v3397_v63  ;;  %187 = vmatprep.mubr.f32.mxu0 %v3092_v3  ;;  %v427_v1 = vld [vmem:[%s4268_s2 + $0x1b0] sm:$0xff]  ;;  %v434_v7 = vld [vmem:[%s4268_s2 + $0x1e8] sm:$0xff]  ;;  %v432_v11 = vld [vmem:[%s4268_s2 + $0x1d8] sm:$0xff] }
  0x2c   :  { %300 = vmatprep.mubr.f32.mxu1 %v3092_v3  ;;  %2396 = vmatprep.subr.bf16.mxu0 %v3407_v2  ;;  %v23_v8 = vld [vmem:[%s4269_s0 + $0x30] sm:$0xff]  ;;  %v436_v12 = vld [vmem:[%s4268_s2 + $0x1f8] sm:$0xff]  ;;  %v3602_v14 = vpack.c.bf16 %v427_v1, %v423_v0  ;;  %v429_v15 = vld [vmem:[%s4268_s2 + $0x1c0] sm:$0xff]  ;;  %v3612_v18 = vpack.c.bf16 %v434_v7, %v430_v5 }
  0x2d   :  { %188 = vmatmul.mubr.f32.gmra.mrb[4].mxu0 %v19_v9  ;;  %2428 = vmatprep.subr.bf16.mxu1 %v3416_v6  ;;  %v433_v17 = vld [vmem:[%s4268_s2 + $0x1e0] sm:$0xff]  ;;  %v431_v20 = vld [vmem:[%s4268_s2 + $0x1d0] sm:$0xff]  ;;  %v24_v24 = vld [vmem:[%s4269_s0 + $0x38] sm:$0xff] }
  0x2e   :  { %301 = vmatmul.mubr.f32.gmra.mrb[4].mxu1 %v19_v9  ;;  %2398 = vmatpush1.bf16.msra.mxu0 %v3428_v10  ;;  %v3592_v9 = vpack.c.bf16 %v425_v61, %v421_v59  ;;  %v435_v21 = vld [vmem:[%s4268_s2 + $0x1f0] sm:$0xff]  ;;  %v3627_v25 = vpack.c.bf16 %v433_v17, %v429_v15  ;;  %v89_v33 = vld [vmem:[%s4270_s3] sm:$0xf] }
  0x2f   :  { %2430 = vmatpush1.bf16.msra.mxu1 %v3438_v13  ;;  %193 = vmatprep.mubr.f32.mxu0 %v3092_v3  ;;  %v3631_v27 = vpack.c.bf16 %v435_v21, %v431_v20  ;;  %v3683_v37 = vrot.slane %v89_v33, %v97_v34  ;;  %v3690_v59 = vrot.slane %v89_v33, %v101_v55 }
  0x30   :  { %306 = vmatprep.mubr.f32.mxu1 %v3092_v3  ;;  %2400 = vmatprep.subr.bf16.mxu0 %v3448_v16 }
  0x31   :  { %194 = vmatmul.mubr.f32.gmra.mrb[6].mxu0 %v20_v22  ;;  %2432 = vmatprep.subr.bf16.mxu1 %v3457_v19 }
  0x32   :  { %307 = vmatmul.mubr.f32.gmra.mrb[6].mxu1 %v20_v22  ;;  %2402 = vmatpush1.bf16.msra.mxu0 %v3469_v23  ;;  %v3621_v22 = vpack.c.bf16 %v436_v12, %v432_v11 }
  0x33   :  { %2434 = vmatpush1.bf16.msra.mxu1 %v3479_v26  ;;  %199 = vmatprep.mubr.f32.mxu0 %v3092_v3 }
  0x34   :  { %312 = vmatprep.mubr.f32.mxu1 %v3092_v3  ;;  %2404 = vmatprep.subr.bf16.mxu0 %v3489_v29 }
  0x35   :  { %200 = vmatmul.mubr.f32.gmra.mrb[8].mxu0 %v21_v35  ;;  %2436 = vmatprep.subr.bf16.mxu1 %v3498_v32 }
  0x36   :  { %313 = vmatmul.mubr.f32.gmra.mrb[8].mxu1 %v21_v35  ;;  %2406 = vmatpush1.bf16.msra.mxu0 %v3510_v36  ;;  %v3681_v35 = vrot.slane %v89_v33, %v93_v31 }
  0x37   :  { %2438 = vmatpush1.bf16.msra.mxu1 %v3520_v40  ;;  %205 = vmatprep.mubr.f32.mxu0 %v3092_v3 }
  0x38   :  { %318 = vmatprep.mubr.f32.mxu1 %v3092_v3  ;;  %2408 = vmatprep.subr.bf16.mxu0 %v3530_v44 }
  0x39   :  { %206 = vmatmul.mubr.f32.gmra.mrb[10].mxu0 %v22_v52  ;;  %2440 = vmatprep.subr.bf16.mxu1 %v3539_v48 }
  0x3a   :  { %319 = vmatmul.mubr.f32.gmra.mrb[10].mxu1 %v22_v52  ;;  %2410 = vmatpush1.bf16.msra.mxu0 %v3551_v54  ;;  %v3687_v52 = vrot.slane %v89_v33, %v105_v42 }
  0x3b   :  { %2442 = vmatpush1.bf16.msra.mxu1 %v3561_v58  ;;  %211 = vmatprep.mubr.f32.mxu0 %v3092_v3 }
  0x3c   :  { %324 = vmatprep.mubr.f32.mxu1 %v3092_v3  ;;  %2412 = vmatprep.subr.bf16.mxu0 %v3571_v62 }
  0x3d   :  { %212 = vmatmul.mubr.f32.gmra.mrb[12].mxu0 %v23_v8  ;;  %2444 = vmatprep.subr.bf16.mxu1 %v3580_v4 }
  0x3e   :  { %325 = vmatmul.mubr.f32.gmra.mrb[12].mxu1 %v23_v8  ;;  %2414 = vmatpush1.bf16.msra.mxu0 %v3592_v9 }
  0x3f   :  { %2446 = vmatpush1.bf16.msra.mxu1 %v3602_v14  ;;  %217 = vmatprep.mubr.f32.mxu0 %v3092_v3 }
  0x40   :  { %330 = vmatprep.mubr.f32.mxu1 %v3092_v3  ;;  %2416 = vmatprep.subr.bf16.mxu0 %v3612_v18 }
  0x41   :  { %218 = vmatmul.mubr.f32.gmra.mrb[14].mxu0 %v24_v24  ;;  %2448 = vmatprep.subr.bf16.mxu1 %v3621_v22 }
  0x42   :  { %331 = vmatmul.mubr.f32.gmra.mrb[14].mxu1 %v24_v24  ;;  %2418 = vmatpush1.bf16.msra.mxu0 %v3627_v25 }
  0x43   :  { %2450 = vmatpush1.bf16.msra.mxu1 %v3631_v27  ;;  %501 = vmatprep.mubr.f32.mxu0 %v3092_v3 }
  0x44   :  { %572 = vmatprep.mubr.f32.mxu1 %v3092_v3  ;;  %2452 = vmatprep.subr.bf16.mxu0 %v3324_v38 }
  0x45   :  { %502 = vmatmul.mubr.f32.vlgmr.msra.gmra.mrb[0].mxu0 %v3092_v3  ;;  %2484 = vmatprep.subr.bf16.mxu1 %v3332_v41 }
  0x46   :  { %573 = vmatmul.mubr.f32.vlgmr.msra.gmra.mrb[0].mxu1 %v3092_v3  ;;  %2454 = vmatpush1.bf16.msra.mxu0 %v3349_v47 }
  0x47   :  { %2486 = vmatpush1.bf16.msra.mxu1 %v3358_v50  ;;  %2456 = vmatprep.subr.bf16.mxu0 %v3367_v53 }
  0x48   :  { %2488 = vmatprep.subr.bf16.mxu1 %v3375_v56  ;;  %740 = vmatprep.mubr.f32.mxu0 %v3092_v3 }
  0x49   :  { %811 = vmatprep.mubr.f32.mxu1 %v3092_v3 }
  0x4a   :  { %2458 = vmatpush1.bf16.msra.mxu0 %v3387_v60 }
  0x4b   :  { %2490 = vmatpush1.bf16.msra.mxu1 %v3397_v63  ;;  %2460 = vmatprep.subr.bf16.mxu0 %v3407_v2 }
  0x4c   :  { %2492 = vmatprep.subr.bf16.mxu1 %v3416_v6 }
  0x4e   :  { %2462 = vmatpush1.bf16.msra.mxu0 %v3428_v10 }
  0x4f   :  { %2494 = vmatpush1.bf16.msra.mxu1 %v3438_v13  ;;  %2464 = vmatprep.subr.bf16.mxu0 %v3448_v16 }
  0x50   :  { %2496 = vmatprep.subr.bf16.mxu1 %v3457_v19 }
  0x52   :  { %2466 = vmatpush1.bf16.msra.mxu0 %v3469_v23 }
  0x53   :  { %2498 = vmatpush1.bf16.msra.mxu1 %v3479_v26  ;;  %2468 = vmatprep.subr.bf16.mxu0 %v3489_v29 }
  0x54   :  { %2500 = vmatprep.subr.bf16.mxu1 %v3498_v32 }
  0x56   :  { %2470 = vmatpush1.bf16.msra.mxu0 %v3510_v36 }
  0x57   :  { %2502 = vmatpush1.bf16.msra.mxu1 %v3520_v40  ;;  %2472 = vmatprep.subr.bf16.mxu0 %v3530_v44 }
  0x58   :  { %2504 = vmatprep.subr.bf16.mxu1 %v3539_v48 }
  0x5a   :  { %2474 = vmatpush1.bf16.msra.mxu0 %v3551_v54 }
  0x5b   :  { %2506 = vmatpush1.bf16.msra.mxu1 %v3561_v58  ;;  %2476 = vmatprep.subr.bf16.mxu0 %v3571_v62 }
  0x5c   :  { %2508 = vmatprep.subr.bf16.mxu1 %v3580_v4 }
  0x5e   :  { %2478 = vmatpush1.bf16.msra.mxu0 %v3592_v9 }
  0x5f   :  { %2510 = vmatpush1.bf16.msra.mxu1 %v3602_v14  ;;  %2480 = vmatprep.subr.bf16.mxu0 %v3612_v18 }
  0x60   :  { %2512 = vmatprep.subr.bf16.mxu1 %v3621_v22 }
  0x62   :  { %2482 = vmatpush1.bf16.msra.mxu0 %v3627_v25 }
  0x63   :  { %2514 = vmatpush1.bf16.msra.mxu1 %v3631_v27  ;;  %2516 = vmatprep.subr.bf16.mxu0 %v3324_v38 }
  0x64   :  { %2548 = vmatprep.subr.bf16.mxu1 %v3332_v41 }
 0x118   :  { %v503_v39 = vpop.f32.mrb[0].mxu0 }
 0x119   :  { %v2899_v43 = vadd.f32 %v503_v39, %v3681_v35  ;;  %v574_v45 = vpop.f32.mrb[0].mxu1  ;;  %v505_v38 = vpop.f32.mrb[1].mxu0 }
 0x11a   :  { %v2900_v41 = vadd.f32 %v505_v38, %v3683_v37  ;;  %v576_v46 = vpop.f32.mrb[1].mxu1  ;;  %v2915_v0 = vadd.f32 %v574_v45, %v3690_v59 }
 0x11b   :  { %v2292_v49 = vmul.f32 -1.442695, %v2899_v43  ;;  %v2916_v57 = vadd.f32 %v576_v46, %v3687_v52 }
 0x11c   :  { %v2293_v51 = vmul.f32 -1.442695, %v2900_v41 }
 0x11d   :  { %2964 = vpow2.f32 %v2292_v49  ;;  %v2294_v61 = vmul.f32 -1.442695, %v2916_v57 }
 0x11e   :  { %2966 = vpow2.f32 %v2293_v51 }
 0x11f   :  { %2968 = vpow2.f32 %v2294_v61 }
 0x120   :  { %2970 = vtanh.f32 %v2915_v0 }
 0x127   :  { %v2965_v1 = vpop.eup %2964 }
 0x128   :  { %v2967_v5 = vpop.eup %2966  ;;  %v586_v7 = vadd.f32 1.0, %v2965_v1 }
 0x129   :  { %v592_v8 = vadd.f32 1.0, %v2967_v5  ;;  %v2969_v11 = vpop.eup %2968 }
 0x12a   :  { %2972 = vrcp.f32 %v586_v7  ;;  %v2971_v12 = vpop.eup %2970  ;;  %v599_v21 = vadd.f32 1.0, %v2969_v11 }
 0x12b   :  { %2974 = vrcp.f32 %v592_v8 }
 0x12c   :  { %2976 = vrcp.f32 %v599_v21 }
 0x134   :  { %v2973_v15 = vpop.eup %2972 }
 0x135   :  { %v2975_v17 = vpop.eup %2974  ;;  %v603_v20 = vmul.f32 %v2973_v15, %v2971_v12  ;;  %v1093_v15 = vld [vmem:[%s4268_s2 + $0x8] sm:$0xff] }
 0x136   :  { %v602_v24 = vmul.f32 0.0, %v2975_v17  ;;  %v2977_v30 = vpop.eup %2976  ;;  %v1097_v17 = vld [vmem:[%s4268_s2 + $0x28] sm:$0xff] }
 0x137   :  { %v3753_v21 = vpack.c.bf16 %v1097_v17, %v1093_v15  ;;  %v1350_v15 = vld [vmem:[%s4268_s2 + $0x90] sm:$0xff] }
 0x138   :  { %v3693_v28 = vadd.f32 %v603_v20, %v602_v24  ;;  %v1095_v20 = vld [vmem:[%s4268_s2 + $0x18] sm:$0xff]  ;;  %v1354_v17 = vld [vmem:[%s4268_s2 + $0xb0] sm:$0xff] }
 0x139   :  { %v1099_v24 = vld [vmem:[%s4268_s2 + $0x38] sm:$0xff] }
 0x13a   :  { %2978 = vtanh.f32 %v3693_v28 }
 0x144   :  { %v2979_v31 = vpop.eup %2978 }
 0x145   :  { %v606_v33 = vmul.f32 %v2979_v31, %v2977_v30  ;;  %v1096_v30 = vld [vmem:[%s4268_s2 + $0x20] sm:$0xff]  ;;  %v3764_v31 = vpack.c.bf16 %v1099_v24, %v1095_v20  ;;  %v3892_v20 = vpack.c.bf16 %v1354_v17, %v1350_v15  ;;  %v1357_v24 = vld [vmem:[%s4268_s2 + $0xc8] sm:$0xff]  ;;  %v1382_v15 = vld [vmem:[%s4268_s2 + $0x190] sm:$0xff] }
 0x147   :  { %607 = vst [vmem:[%s4271_s4] sm:$0xff] %v606_v33  ;;  %741 = vmatmul.mubr.f32.vlgmr.msra.gmra.mrb[2].mxu0 %v606_v33  ;;  %812 = vmatmul.mubr.f32.vlgmr.msra.gmra.mrb[2].mxu1 %v606_v33 }
 0x148   :  { %2518 = vmatpush1.bf16.msra.mxu0 %v3349_v47  ;;  %2550 = vmatpush1.bf16.msra.mxu1 %v3358_v50 }
 0x149   :  { %2520 = vmatprep.subr.bf16.mxu0 %v3367_v53  ;;  %2552 = vmatprep.subr.bf16.mxu1 %v3375_v56 }
 0x14a   :  { %980 = vmatprep.mubr.f32.mxu0 %v3092_v3  ;;  %1051 = vmatprep.mubr.f32.mxu1 %v3092_v3 }
 0x14c   :  { %2522 = vmatpush1.bf16.msra.mxu0 %v3387_v60  ;;  %2554 = vmatpush1.bf16.msra.mxu1 %v3397_v63 }
 0x14d   :  { %2524 = vmatprep.subr.bf16.mxu0 %v3407_v2  ;;  %2556 = vmatprep.subr.bf16.mxu1 %v3416_v6 }
 0x150   :  { %2526 = vmatpush1.bf16.msra.mxu0 %v3428_v10  ;;  %2558 = vmatpush1.bf16.msra.mxu1 %v3438_v13 }
 0x151   :  { %2528 = vmatprep.subr.bf16.mxu0 %v3448_v16  ;;  %2560 = vmatprep.subr.bf16.mxu1 %v3457_v19 }
 0x154   :  { %2530 = vmatpush1.bf16.msra.mxu0 %v3469_v23  ;;  %2562 = vmatpush1.bf16.msra.mxu1 %v3479_v26 }
 0x155   :  { %2532 = vmatprep.subr.bf16.mxu0 %v3489_v29  ;;  %2564 = vmatprep.subr.bf16.mxu1 %v3498_v32 }
 0x158   :  { %2534 = vmatpush1.bf16.msra.mxu0 %v3510_v36  ;;  %2566 = vmatpush1.bf16.msra.mxu1 %v3520_v40 }
 0x159   :  { %2536 = vmatprep.subr.bf16.mxu0 %v3530_v44  ;;  %2568 = vmatprep.subr.bf16.mxu1 %v3539_v48 }
 0x15c   :  { %2538 = vmatpush1.bf16.msra.mxu0 %v3551_v54  ;;  %2570 = vmatpush1.bf16.msra.mxu1 %v3561_v58 }
 0x15d   :  { %2540 = vmatprep.subr.bf16.mxu0 %v3571_v62  ;;  %2572 = vmatprep.subr.bf16.mxu1 %v3580_v4 }
 0x160   :  { %2542 = vmatpush1.bf16.msra.mxu0 %v3592_v9  ;;  %2574 = vmatpush1.bf16.msra.mxu1 %v3602_v14 }
 0x161   :  { %2544 = vmatprep.subr.bf16.mxu0 %v3612_v18  ;;  %2576 = vmatprep.subr.bf16.mxu1 %v3621_v22 }
 0x164   :  { %2546 = vmatpush1.bf16.msra.mxu0 %v3627_v25  ;;  %2578 = vmatpush1.bf16.msra.mxu1 %v3631_v27 }
 0x165   :  { %2580 = vmatprep.subr.bf16.mxu0 %v3753_v21  ;;  %2612 = vmatprep.subr.bf16.mxu1 %v3764_v31 }
 0x21a   :  { %v742_v47 = vpop.f32.mrb[2].mxu0  ;;  %v813_v50 = vpop.f32.mrb[2].mxu1 }
 0x21b   :  { %v2901_v53 = vadd.f32 %v742_v47, %v3681_v35  ;;  %v744_v56 = vpop.f32.mrb[3].mxu0  ;;  %v815_v60 = vpop.f32.mrb[3].mxu1  ;;  %v2917_v45 = vadd.f32 %v813_v50, %v3690_v59  ;;  %v1094_v47 = vld [vmem:[%s4268_s2 + $0x10] sm:$0xff] }
 0x21c   :  { %v2902_v63 = vadd.f32 %v744_v56, %v3683_v37  ;;  %v2918_v42 = vadd.f32 %v815_v60, %v3687_v52  ;;  %v1098_v50 = vld [vmem:[%s4268_s2 + $0x30] sm:$0xff]  ;;  %v1101_v56 = vld [vmem:[%s4268_s2 + $0x48] sm:$0xff] }
 0x21d   :  { %v2295_v34 = vmul.f32 -1.442695, %v2901_v53  ;;  %v3775_v53 = vpack.c.bf16 %v1098_v50, %v1094_v47  ;;  %v1105_v60 = vld [vmem:[%s4268_s2 + $0x68] sm:$0xff]  ;;  %v1363_v50 = vld [vmem:[%s4268_s2 + $0xf8] sm:$0xff] }
 0x21e   :  { %v2296_v39 = vmul.f32 -1.442695, %v2902_v63  ;;  %v2297_v43 = vmul.f32 -1.442695, %v2918_v42  ;;  %v1103_v63 = vld [vmem:[%s4268_s2 + $0x58] sm:$0xff]  ;;  %v1100_v42 = vld [vmem:[%s4268_s2 + $0x40] sm:$0xff] }
 0x21f   :  { %2980 = vpow2.f32 %v2295_v34  ;;  %v3789_v34 = vpack.c.bf16 %v1105_v60, %v1101_v56  ;;  %v1356_v56 = vld [vmem:[%s4268_s2 + $0xc0] sm:$0xff] }
 0x220   :  { %2982 = vpow2.f32 %v2296_v39  ;;  %v1107_v39 = vld [vmem:[%s4268_s2 + $0x78] sm:$0xff]  ;;  %v1360_v60 = vld [vmem:[%s4268_s2 + $0xe0] sm:$0xff] }
 0x221   :  { %2984 = vpow2.f32 %v2297_v43  ;;  %v1104_v43 = vld [vmem:[%s4268_s2 + $0x60] sm:$0xff] }
 0x222   :  { %2986 = vtanh.f32 %v2917_v45  ;;  %v3800_v45 = vpack.c.bf16 %v1107_v39, %v1103_v63  ;;  %v3919_v39 = vpack.c.bf16 %v1360_v60, %v1356_v56  ;;  %v1391_v60 = vld [vmem:[%s4268_s2 + $0x1d8] sm:$0xff] }
 0x229   :  { %v2981_v38 = vpop.eup %2980 }
 0x22a   :  { %v2983_v41 = vpop.eup %2982  ;;  %v825_v46 = vadd.f32 1.0, %v2981_v38  ;;  %v3802_v38 = vpack.c.bf16 %v1104_v43, %v1100_v42  ;;  %v1358_v42 = vld [vmem:[%s4268_s2 + $0xd0] sm:$0xff] }
 0x22b   :  { %v831_v49 = vadd.f32 1.0, %v2983_v41  ;;  %v2985_v51 = vpop.eup %2984  ;;  %v1102_v41 = vld [vmem:[%s4268_s2 + $0x50] sm:$0xff] }
 0x22c   :  { %2988 = vrcp.f32 %v825_v46  ;;  %v2987_v55 = vpop.eup %2986  ;;  %v838_v1 = vadd.f32 1.0, %v2985_v51  ;;  %v1106_v46 = vld [vmem:[%s4268_s2 + $0x70] sm:$0xff] }
 0x22d   :  { %2990 = vrcp.f32 %v831_v49  ;;  %v3811_v49 = vpack.c.bf16 %v1106_v46, %v1102_v41  ;;  %v1362_v43 = vld [vmem:[%s4268_s2 + $0xf0] sm:$0xff]  ;;  %v1365_v46 = vld [vmem:[%s4268_s2 + $0x108] sm:$0xff] }
 0x22e   :  { %2992 = vrcp.f32 %v838_v1  ;;  %v3928_v41 = vpack.c.bf16 %v1362_v43, %v1358_v42  ;;  %v1395_v42 = vld [vmem:[%s4268_s2 + $0x1f8] sm:$0xff]  ;;  %v1388_v43 = vld [vmem:[%s4268_s2 + $0x1c0] sm:$0xff] }
 0x236   :  { %v2989_v57 = vpop.eup %2988 }
 0x237   :  { %v2991_v61 = vpop.eup %2990  ;;  %v842_v0 = vmul.f32 %v2989_v57, %v2987_v55  ;;  %v1349_v57 = vld [vmem:[%s4268_s2 + $0x88] sm:$0xff] }
 0x238   :  { %v841_v5 = vmul.f32 %v2991_v61, %v3693_v28  ;;  %v2993_v8 = vpop.eup %2992  ;;  %v1092_v28 = vld [vmem:[%s4268_s2] sm:$0xff]  ;;  %v1353_v61 = vld [vmem:[%s4268_s2 + $0xa8] sm:$0xff] }
 0x239   :  { %v3766_v33 = vpack.c.bf16 %v1096_v30, %v1092_v28  ;;  %v3870_v1 = vpack.c.bf16 %v1353_v61, %v1349_v57  ;;  %v1361_v28 = vld [vmem:[%s4268_s2 + $0xe8] sm:$0xff]  ;;  %v1359_v30 = vld [vmem:[%s4268_s2 + $0xd8] sm:$0xff] }
 0x23a   :  { %v3736_v7 = vadd.f32 %v842_v0, %v841_v5  ;;  %v1351_v0 = vld [vmem:[%s4268_s2 + $0x98] sm:$0xff]  ;;  %v3906_v47 = vpack.c.bf16 %v1361_v28, %v1357_v24  ;;  %v3917_v63 = vpack.c.bf16 %v1363_v50, %v1359_v30  ;;  %v1386_v24 = vld [vmem:[%s4268_s2 + $0x1b0] sm:$0xff]  ;;  %v1389_v28 = vld [vmem:[%s4268_s2 + $0x1c8] sm:$0xff] }
 0x23b   :  { %v1355_v5 = vld [vmem:[%s4268_s2 + $0xb8] sm:$0xff]  ;;  %v1393_v30 = vld [vmem:[%s4268_s2 + $0x1e8] sm:$0xff]  ;;  %v4042_v50 = vpack.c.bf16 %v1386_v24, %v1382_v15 }
 0x23c   :  { %2994 = vtanh.f32 %v3736_v7  ;;  %v1383_v57 = vld [vmem:[%s4268_s2 + $0x198] sm:$0xff]  ;;  %v4044_v56 = vpack.c.bf16 %v1393_v30, %v1389_v28 }
 0x23d   :  { %v1387_v61 = vld [vmem:[%s4268_s2 + $0x1b8] sm:$0xff] }
 0x246   :  { %v2995_v11 = vpop.eup %2994 }
 0x247   :  { %v845_v12 = vmul.f32 %v2995_v11, %v2993_v8  ;;  %v1352_v8 = vld [vmem:[%s4268_s2 + $0xa0] sm:$0xff]  ;;  %v3881_v11 = vpack.c.bf16 %v1355_v5, %v1351_v0  ;;  %v4017_v5 = vpack.c.bf16 %v1387_v61, %v1383_v57 }
 0x249   :  { %2298 = vst [vmem:[%s4271_s4 + $0x8] sm:$0xff] %v845_v12  ;;  %981 = vmatmul.mubr.f32.vlgmr.msra.gmra.mrb[4].mxu0 %v845_v12  ;;  %1052 = vmatmul.mubr.f32.vlgmr.msra.gmra.mrb[4].mxu1 %v845_v12 }
 0x24a   :  { %1220 = vmatprep.mubr.f32.mxu0 %v3092_v3  ;;  %1291 = vmatprep.mubr.f32.mxu1 %v3092_v3 }
 0x24b   :  { %2582 = vmatpush1.bf16.msra.mxu0 %v3766_v33  ;;  %2614 = vmatpush1.bf16.msra.mxu1 %v3775_v53 }
 0x24c   :  { %2584 = vmatprep.subr.bf16.mxu0 %v3789_v34  ;;  %2616 = vmatprep.subr.bf16.mxu1 %v3800_v45 }
 0x24f   :  { %2586 = vmatpush1.bf16.msra.mxu0 %v3802_v38  ;;  %2618 = vmatpush1.bf16.msra.mxu1 %v3811_v49 }
 0x250   :  { %2588 = vmatprep.subr.bf16.mxu0 %v3407_v2  ;;  %2620 = vmatprep.subr.bf16.mxu1 %v3416_v6 }
 0x253   :  { %2590 = vmatpush1.bf16.msra.mxu0 %v3428_v10  ;;  %2622 = vmatpush1.bf16.msra.mxu1 %v3438_v13 }
 0x254   :  { %2592 = vmatprep.subr.bf16.mxu0 %v3448_v16  ;;  %2624 = vmatprep.subr.bf16.mxu1 %v3457_v19 }
 0x257   :  { %2594 = vmatpush1.bf16.msra.mxu0 %v3469_v23  ;;  %2626 = vmatpush1.bf16.msra.mxu1 %v3479_v26 }
 0x258   :  { %2596 = vmatprep.subr.bf16.mxu0 %v3489_v29  ;;  %2628 = vmatprep.subr.bf16.mxu1 %v3498_v32 }
 0x25b   :  { %2598 = vmatpush1.bf16.msra.mxu0 %v3510_v36  ;;  %2630 = vmatpush1.bf16.msra.mxu1 %v3520_v40 }
 0x25c   :  { %2600 = vmatprep.subr.bf16.mxu0 %v3530_v44  ;;  %2632 = vmatprep.subr.bf16.mxu1 %v3539_v48 }
 0x25f   :  { %2602 = vmatpush1.bf16.msra.mxu0 %v3551_v54  ;;  %2634 = vmatpush1.bf16.msra.mxu1 %v3561_v58 }
 0x260   :  { %2604 = vmatprep.subr.bf16.mxu0 %v3571_v62  ;;  %2636 = vmatprep.subr.bf16.mxu1 %v3580_v4 }
 0x263   :  { %2606 = vmatpush1.bf16.msra.mxu0 %v3592_v9  ;;  %2638 = vmatpush1.bf16.msra.mxu1 %v3602_v14 }
 0x264   :  { %2608 = vmatprep.subr.bf16.mxu0 %v3612_v18  ;;  %2640 = vmatprep.subr.bf16.mxu1 %v3621_v22 }
 0x267   :  { %2610 = vmatpush1.bf16.msra.mxu0 %v3627_v25  ;;  %2642 = vmatpush1.bf16.msra.mxu1 %v3631_v27 }
 0x268   :  { %2644 = vmatprep.subr.bf16.mxu0 %v3753_v21  ;;  %2676 = vmatprep.subr.bf16.mxu1 %v3764_v31 }
 0x31c   :  { %v982_v2 = vpop.f32.mrb[4].mxu0  ;;  %v1053_v6 = vpop.f32.mrb[4].mxu1 }
 0x31d   :  { %v2903_v10 = vadd.f32 %v982_v2, %v3681_v35  ;;  %v984_v13 = vpop.f32.mrb[5].mxu0  ;;  %v1055_v16 = vpop.f32.mrb[5].mxu1  ;;  %v2919_v36 = vadd.f32 %v1053_v6, %v3690_v59  ;;  %v1369_v2 = vld [vmem:[%s4268_s2 + $0x128] sm:$0xff]  ;;  %v1367_v6 = vld [vmem:[%s4268_s2 + $0x118] sm:$0xff] }
 0x31e   :  { %v2904_v19 = vadd.f32 %v984_v13, %v3683_v37  ;;  %v2920_v29 = vadd.f32 %v1055_v16, %v3687_v52  ;;  %v1371_v13 = vld [vmem:[%s4268_s2 + $0x138] sm:$0xff]  ;;  %v1364_v16 = vld [vmem:[%s4268_s2 + $0x100] sm:$0xff] }
 0x31f   :  { %v2299_v23 = vmul.f32 -1.442695, %v2903_v10  ;;  %v3942_v10 = vpack.c.bf16 %v1369_v2, %v1365_v46  ;;  %v4056_v46 = vpack.c.bf16 %v1395_v42, %v1391_v60  ;;  %v1392_v2 = vld [vmem:[%s4268_s2 + $0x1e0] sm:$0xff] }
 0x320   :  { %v2300_v26 = vmul.f32 -1.442695, %v2904_v19  ;;  %v2301_v32 = vmul.f32 -1.442695, %v2920_v29  ;;  %v1368_v19 = vld [vmem:[%s4268_s2 + $0x120] sm:$0xff]  ;;  %v1366_v29 = vld [vmem:[%s4268_s2 + $0x110] sm:$0xff] }
 0x321   :  { %2996 = vpow2.f32 %v2299_v23  ;;  %v3953_v23 = vpack.c.bf16 %v1371_v13, %v1367_v6  ;;  %v1390_v6 = vld [vmem:[%s4268_s2 + $0x1d0] sm:$0xff] }
 0x322   :  { %2998 = vpow2.f32 %v2300_v26  ;;  %v3955_v26 = vpack.c.bf16 %v1368_v19, %v1364_v16  ;;  %v1394_v13 = vld [vmem:[%s4268_s2 + $0x1f0] sm:$0xff]  ;;  %v4068_v16 = vpack.c.bf16 %v1392_v2, %v1388_v43 }
 0x323   :  { %3000 = vpow2.f32 %v2301_v32  ;;  %v1370_v32 = vld [vmem:[%s4268_s2 + $0x130] sm:$0xff]  ;;  %v4072_v19 = vpack.c.bf16 %v1394_v13, %v1390_v6 }
 0x324   :  { %3002 = vtanh.f32 %v2919_v36  ;;  %v3964_v36 = vpack.c.bf16 %v1370_v32, %v1366_v29 }
 0x32b   :  { %v2997_v40 = vpop.eup %2996 }
 0x32c   :  { %v2999_v44 = vpop.eup %2998  ;;  %v1065_v48 = vadd.f32 1.0, %v2997_v40  ;;  %v1373_v40 = vld [vmem:[%s4268_s2 + $0x148] sm:$0xff] }
 0x32d   :  { %v1071_v54 = vadd.f32 1.0, %v2999_v44  ;;  %v3001_v58 = vpop.eup %3000  ;;  %v1377_v44 = vld [vmem:[%s4268_s2 + $0x168] sm:$0xff] }
 0x32e   :  { %3004 = vrcp.f32 %v1065_v48  ;;  %v3003_v62 = vpop.eup %3002  ;;  %v1078_v18 = vadd.f32 1.0, %v3001_v58  ;;  %v1375_v48 = vld [vmem:[%s4268_s2 + $0x158] sm:$0xff] }
 0x32f   :  { %3006 = vrcp.f32 %v1071_v54  ;;  %v3977_v54 = vpack.c.bf16 %v1377_v44, %v1373_v40  ;;  %v1379_v58 = vld [vmem:[%s4268_s2 + $0x178] sm:$0xff] }
 0x330   :  { %3008 = vrcp.f32 %v1078_v18  ;;  %v1374_v18 = vld [vmem:[%s4268_s2 + $0x150] sm:$0xff] }
 0x338   :  { %v3005_v4 = vpop.eup %3004 }
 0x339   :  { %v3007_v9 = vpop.eup %3006  ;;  %v1082_v14 = vmul.f32 %v3005_v4, %v3003_v62  ;;  %v1372_v62 = vld [vmem:[%s4268_s2 + $0x140] sm:$0xff] }
 0x33a   :  { %v1081_v22 = vmul.f32 %v3007_v9, %v3736_v7  ;;  %v3009_v27 = vpop.eup %3008  ;;  %v1348_v7 = vld [vmem:[%s4268_s2 + $0x80] sm:$0xff]  ;;  %v3989_v9 = vpack.c.bf16 %v1379_v58, %v1375_v48 }
 0x33b   :  { %v3883_v12 = vpack.c.bf16 %v1352_v8, %v1348_v7  ;;  %v1376_v4 = vld [vmem:[%s4268_s2 + $0x160] sm:$0xff] }
 0x33c   :  { %v3847_v25 = vadd.f32 %v1082_v14, %v1081_v22  ;;  %v3991_v14 = vpack.c.bf16 %v1376_v4, %v1372_v62  ;;  %v1378_v22 = vld [vmem:[%s4268_s2 + $0x170] sm:$0xff]  ;;  %v1380_v7 = vld [vmem:[%s4268_s2 + $0x180] sm:$0xff] }
 0x33d   :  { %v1384_v8 = vld [vmem:[%s4268_s2 + $0x1a0] sm:$0xff] }
 0x33e   :  { %3010 = vtanh.f32 %v3847_v25  ;;  %v4029_v17 = vpack.c.bf16 %v1384_v8, %v1380_v7 }
 0x348   :  { %v3011_v51 = vpop.eup %3010 }
 0x349   :  { %v1085_v55 = vmul.f32 %v3011_v51, %v3009_v27  ;;  %v1381_v27 = vld [vmem:[%s4268_s2 + $0x188] sm:$0xff]  ;;  %v4003_v51 = vpack.c.bf16 %v1378_v22, %v1374_v18 }
 0x34b   :  { %2302 = vst [vmem:[%s4271_s4 + $0x10] sm:$0xff] %v1085_v55  ;;  %1221 = vmatmul.mubr.f32.vlgmr.msra.gmra.mrb[6].mxu0 %v1085_v55  ;;  %1292 = vmatmul.mubr.f32.vlgmr.msra.gmra.mrb[6].mxu1 %v1085_v55  ;;  %v1385_v55 = vld [vmem:[%s4268_s2 + $0x1a8] sm:$0xff] }
 0x34c   :  { %2646 = vmatpush1.bf16.msra.mxu0 %v3766_v33  ;;  %2678 = vmatpush1.bf16.msra.mxu1 %v3775_v53  ;;  %v4015_v0 = vpack.c.bf16 %v1385_v55, %v1381_v27 }
 0x34d   :  { %2648 = vmatprep.subr.bf16.mxu0 %v3789_v34  ;;  %2680 = vmatprep.subr.bf16.mxu1 %v3800_v45 }
 0x34e   :  { %1460 = vmatprep.mubr.f32.mxu0 %v3092_v3  ;;  %1531 = vmatprep.mubr.f32.mxu1 %v3092_v3 }
 0x350   :  { %2650 = vmatpush1.bf16.msra.mxu0 %v3802_v38  ;;  %2682 = vmatpush1.bf16.msra.mxu1 %v3811_v49 }
 0x351   :  { %2652 = vmatprep.subr.bf16.mxu0 %v3870_v1  ;;  %2684 = vmatprep.subr.bf16.mxu1 %v3881_v11 }
 0x354   :  { %2654 = vmatpush1.bf16.msra.mxu0 %v3883_v12  ;;  %2686 = vmatpush1.bf16.msra.mxu1 %v3892_v20 }
 0x355   :  { %2656 = vmatprep.subr.bf16.mxu0 %v3906_v47  ;;  %2688 = vmatprep.subr.bf16.mxu1 %v3917_v63 }
 0x358   :  { %2658 = vmatpush1.bf16.msra.mxu0 %v3919_v39  ;;  %2690 = vmatpush1.bf16.msra.mxu1 %v3928_v41 }
 0x359   :  { %2660 = vmatprep.subr.bf16.mxu0 %v3942_v10  ;;  %2692 = vmatprep.subr.bf16.mxu1 %v3953_v23 }
 0x35c   :  { %2662 = vmatpush1.bf16.msra.mxu0 %v3955_v26  ;;  %2694 = vmatpush1.bf16.msra.mxu1 %v3964_v36 }
 0x35d   :  { %2664 = vmatprep.subr.bf16.mxu0 %v3977_v54  ;;  %2696 = vmatprep.subr.bf16.mxu1 %v3989_v9 }
 0x360   :  { %2666 = vmatpush1.bf16.msra.mxu0 %v3991_v14  ;;  %2698 = vmatpush1.bf16.msra.mxu1 %v4003_v51 }
 0x361   :  { %2668 = vmatprep.subr.bf16.mxu0 %v4015_v0  ;;  %2700 = vmatprep.subr.bf16.mxu1 %v4017_v5 }
 0x364   :  { %2670 = vmatpush1.bf16.msra.mxu0 %v4029_v17  ;;  %2702 = vmatpush1.bf16.msra.mxu1 %v4042_v50 }
 0x365   :  { %2672 = vmatprep.subr.bf16.mxu0 %v4044_v56  ;;  %2704 = vmatprep.subr.bf16.mxu1 %v4056_v46 }
 0x368   :  { %2674 = vmatpush1.bf16.msra.mxu0 %v4068_v16  ;;  %2706 = vmatpush1.bf16.msra.mxu1 %v4072_v19 }
 0x369   :  { %2708 = vmatprep.subr.bf16.mxu0 %v3753_v21  ;;  %2740 = vmatprep.subr.bf16.mxu1 %v3764_v31 }
 0x41e   :  { %v1222_v29 = vpop.f32.mrb[6].mxu0  ;;  %v1293_v32 = vpop.f32.mrb[6].mxu1 }
 0x41f   :  { %v2905_v40 = vadd.f32 %v1222_v29, %v3681_v35  ;;  %v1224_v44 = vpop.f32.mrb[7].mxu0  ;;  %v1295_v48 = vpop.f32.mrb[7].mxu1  ;;  %v2921_v27 = vadd.f32 %v1293_v32, %v3690_v59 }
 0x420   :  { %v2906_v58 = vadd.f32 %v1224_v44, %v3683_v37  ;;  %v2922_v18 = vadd.f32 %v1295_v48, %v3687_v52 }
 0x421   :  { %v2303_v62 = vmul.f32 -1.442695, %v2905_v40 }
 0x422   :  { %v2304_v4 = vmul.f32 -1.442695, %v2906_v58  ;;  %v2305_v22 = vmul.f32 -1.442695, %v2922_v18 }
 0x423   :  { %3012 = vpow2.f32 %v2303_v62 }
 0x424   :  { %3014 = vpow2.f32 %v2304_v4 }
 0x425   :  { %3016 = vpow2.f32 %v2305_v22 }
 0x426   :  { %3018 = vtanh.f32 %v2921_v27 }
 0x42d   :  { %v3013_v55 = vpop.eup %3012 }
 0x42e   :  { %v3015_v57 = vpop.eup %3014  ;;  %v1305_v61 = vadd.f32 1.0, %v3013_v55 }
 0x42f   :  { %v1311_v7 = vadd.f32 1.0, %v3015_v57  ;;  %v3017_v8 = vpop.eup %3016 }
 0x430   :  { %3020 = vrcp.f32 %v1305_v61  ;;  %v3019_v15 = vpop.eup %3018  ;;  %v1318_v60 = vadd.f32 1.0, %v3017_v8 }
 0x431   :  { %3022 = vrcp.f32 %v1311_v7 }
 0x432   :  { %3024 = vrcp.f32 %v1318_v60 }
 0x43a   :  { %v3021_v24 = vpop.eup %3020 }
 0x43b   :  { %v3023_v28 = vpop.eup %3022  ;;  %v1322_v30 = vmul.f32 %v3021_v24, %v3019_v15 }
 0x43c   :  { %v1321_v42 = vmul.f32 %v3023_v28, %v3847_v25  ;;  %v3025_v2 = vpop.eup %3024 }
 0x43e   :  { %v4084_v43 = vadd.f32 %v1322_v30, %v1321_v42 }
 0x440   :  { %3026 = vtanh.f32 %v4084_v43 }
 0x44a   :  { %v3027_v6 = vpop.eup %3026 }
 0x44b   :  { %v1325_v13 = vmul.f32 %v3027_v6, %v3025_v2 }
 0x44d   :  { %2306 = vst [vmem:[%s4271_s4 + $0x18] sm:$0xff] %v1325_v13  ;;  %1461 = vmatmul.mubr.f32.vlgmr.msra.gmra.mrb[8].mxu0 %v1325_v13  ;;  %1532 = vmatmul.mubr.f32.vlgmr.msra.gmra.mrb[8].mxu1 %v1325_v13 }
 0x44e   :  { %2710 = vmatpush1.bf16.msra.mxu0 %v3766_v33  ;;  %2742 = vmatpush1.bf16.msra.mxu1 %v3775_v53 }
 0x44f   :  { %2712 = vmatprep.subr.bf16.mxu0 %v3789_v34  ;;  %2744 = vmatprep.subr.bf16.mxu1 %v3800_v45 }
 0x450   :  { %1700 = vmatprep.mubr.f32.mxu0 %v3092_v3  ;;  %1771 = vmatprep.mubr.f32.mxu1 %v3092_v3 }
 0x452   :  { %2714 = vmatpush1.bf16.msra.mxu0 %v3802_v38  ;;  %2746 = vmatpush1.bf16.msra.mxu1 %v3811_v49 }
 0x453   :  { %2716 = vmatprep.subr.bf16.mxu0 %v3870_v1  ;;  %2748 = vmatprep.subr.bf16.mxu1 %v3881_v11 }
 0x456   :  { %2718 = vmatpush1.bf16.msra.mxu0 %v3883_v12  ;;  %2750 = vmatpush1.bf16.msra.mxu1 %v3892_v20 }
 0x457   :  { %2720 = vmatprep.subr.bf16.mxu0 %v3906_v47  ;;  %2752 = vmatprep.subr.bf16.mxu1 %v3917_v63 }
 0x45a   :  { %2722 = vmatpush1.bf16.msra.mxu0 %v3919_v39  ;;  %2754 = vmatpush1.bf16.msra.mxu1 %v3928_v41 }
 0x45b   :  { %2724 = vmatprep.subr.bf16.mxu0 %v3942_v10  ;;  %2756 = vmatprep.subr.bf16.mxu1 %v3953_v23 }
 0x45e   :  { %2726 = vmatpush1.bf16.msra.mxu0 %v3955_v26  ;;  %2758 = vmatpush1.bf16.msra.mxu1 %v3964_v36 }
 0x45f   :  { %2728 = vmatprep.subr.bf16.mxu0 %v3977_v54  ;;  %2760 = vmatprep.subr.bf16.mxu1 %v3989_v9 }
 0x462   :  { %2730 = vmatpush1.bf16.msra.mxu0 %v3991_v14  ;;  %2762 = vmatpush1.bf16.msra.mxu1 %v4003_v51 }
 0x463   :  { %2732 = vmatprep.subr.bf16.mxu0 %v4015_v0  ;;  %2764 = vmatprep.subr.bf16.mxu1 %v4017_v5 }
 0x466   :  { %2734 = vmatpush1.bf16.msra.mxu0 %v4029_v17  ;;  %2766 = vmatpush1.bf16.msra.mxu1 %v4042_v50 }
 0x467   :  { %2736 = vmatprep.subr.bf16.mxu0 %v4044_v56  ;;  %2768 = vmatprep.subr.bf16.mxu1 %v4056_v46 }
 0x46a   :  { %2738 = vmatpush1.bf16.msra.mxu0 %v4068_v16  ;;  %2770 = vmatpush1.bf16.msra.mxu1 %v4072_v19 }
 0x46b   :  { %2772 = vmatprep.subr.bf16.mxu0 %v3753_v21  ;;  %2804 = vmatprep.subr.bf16.mxu1 %v3764_v31 }
 0x520   :  { %v1462_v25 = vpop.f32.mrb[8].mxu0  ;;  %v1533_v29 = vpop.f32.mrb[8].mxu1 }
 0x521   :  { %v2907_v32 = vadd.f32 %v1462_v25, %v3681_v35  ;;  %v1464_v40 = vpop.f32.mrb[9].mxu0  ;;  %v1535_v44 = vpop.f32.mrb[9].mxu1  ;;  %v2923_v22 = vadd.f32 %v1533_v29, %v3690_v59 }
 0x522   :  { %v2908_v48 = vadd.f32 %v1464_v40, %v3683_v37  ;;  %v2924_v4 = vadd.f32 %v1535_v44, %v3687_v52 }
 0x523   :  { %v2307_v58 = vmul.f32 -1.442695, %v2907_v32 }
 0x524   :  { %v2308_v62 = vmul.f32 -1.442695, %v2908_v48  ;;  %v2309_v18 = vmul.f32 -1.442695, %v2924_v4 }
 0x525   :  { %3028 = vpow2.f32 %v2307_v58 }
 0x526   :  { %3030 = vpow2.f32 %v2308_v62 }
 0x527   :  { %3032 = vpow2.f32 %v2309_v18 }
 0x528   :  { %3034 = vtanh.f32 %v2923_v22 }
 0x52f   :  { %v3029_v21 = vpop.eup %3028 }
 0x530   :  { %v3031_v27 = vpop.eup %3030  ;;  %v1545_v31 = vadd.f32 1.0, %v3029_v21 }
 0x531   :  { %v1551_v55 = vadd.f32 1.0, %v3031_v27  ;;  %v3033_v57 = vpop.eup %3032 }
 0x532   :  { %3036 = vrcp.f32 %v1545_v31  ;;  %v3035_v61 = vpop.eup %3034  ;;  %v1558_v24 = vadd.f32 1.0, %v3033_v57 }
 0x533   :  { %3038 = vrcp.f32 %v1551_v55 }
 0x534   :  { %3040 = vrcp.f32 %v1558_v24 }
 0x53c   :  { %v3037_v7 = vpop.eup %3036 }
 0x53d   :  { %v3039_v8 = vpop.eup %3038  ;;  %v1562_v15 = vmul.f32 %v3037_v7, %v3035_v61  ;;  %v2053_v7 = vld [vmem:[%s4268_s2 + $0x8] sm:$0xff] }
 0x53e   :  { %v1561_v28 = vmul.f32 %v3039_v8, %v4084_v43  ;;  %v3041_v60 = vpop.eup %3040  ;;  %v2057_v8 = vld [vmem:[%s4268_s2 + $0x28] sm:$0xff] }
 0x53f   :  { %v2835_v24 = vpack.c.bf16 %v2057_v8, %v2053_v7 }
 0x540   :  { %v4129_v30 = vadd.f32 %v1562_v15, %v1561_v28  ;;  %v2055_v15 = vld [vmem:[%s4268_s2 + $0x18] sm:$0xff] }
 0x541   :  { %v2059_v28 = vld [vmem:[%s4268_s2 + $0x38] sm:$0xff] }
 0x542   :  { %3042 = vtanh.f32 %v4129_v30 }
 0x54c   :  { %v3043_v42 = vpop.eup %3042 }
 0x54d   :  { %v1565_v2 = vmul.f32 %v3043_v42, %v3041_v60  ;;  %v2867_v60 = vpack.c.bf16 %v2059_v28, %v2055_v15 }
 0x54f   :  { %2310 = vst [vmem:[%s4271_s4 + $0x20] sm:$0xff] %v1565_v2  ;;  %1701 = vmatmul.mubr.f32.vlgmr.msra.gmra.mrb[10].mxu0 %v1565_v2  ;;  %1772 = vmatmul.mubr.f32.vlgmr.msra.gmra.mrb[10].mxu1 %v1565_v2  ;;  %v2054_v2 = vld [vmem:[%s4268_s2 + $0x10] sm:$0xff] }
 0x550   :  { %2774 = vmatpush1.bf16.msra.mxu0 %v3766_v33  ;;  %2806 = vmatpush1.bf16.msra.mxu1 %v3775_v53 }
 0x551   :  { %2776 = vmatprep.subr.bf16.mxu0 %v3789_v34  ;;  %2808 = vmatprep.subr.bf16.mxu1 %v3800_v45 }
 0x552   :  { %1940 = vmatprep.mubr.f32.mxu0 %v3092_v3  ;;  %2011 = vmatprep.mubr.f32.mxu1 %v3092_v3 }
 0x554   :  { %2778 = vmatpush1.bf16.msra.mxu0 %v3802_v38  ;;  %2810 = vmatpush1.bf16.msra.mxu1 %v3811_v49 }
 0x555   :  { %2780 = vmatprep.subr.bf16.mxu0 %v3870_v1  ;;  %2812 = vmatprep.subr.bf16.mxu1 %v3881_v11 }
 0x558   :  { %2782 = vmatpush1.bf16.msra.mxu0 %v3883_v12  ;;  %2814 = vmatpush1.bf16.msra.mxu1 %v3892_v20 }
 0x559   :  { %2784 = vmatprep.subr.bf16.mxu0 %v3906_v47  ;;  %2816 = vmatprep.subr.bf16.mxu1 %v3917_v63 }
 0x55c   :  { %2786 = vmatpush1.bf16.msra.mxu0 %v3919_v39  ;;  %2818 = vmatpush1.bf16.msra.mxu1 %v3928_v41 }
 0x55d   :  { %2788 = vmatprep.subr.bf16.mxu0 %v3942_v10  ;;  %2820 = vmatprep.subr.bf16.mxu1 %v3953_v23 }
 0x560   :  { %2790 = vmatpush1.bf16.msra.mxu0 %v3955_v26  ;;  %2822 = vmatpush1.bf16.msra.mxu1 %v3964_v36 }
 0x561   :  { %2792 = vmatprep.subr.bf16.mxu0 %v3977_v54  ;;  %2824 = vmatprep.subr.bf16.mxu1 %v3989_v9 }
 0x564   :  { %2794 = vmatpush1.bf16.msra.mxu0 %v3991_v14  ;;  %2826 = vmatpush1.bf16.msra.mxu1 %v4003_v51 }
 0x565   :  { %2796 = vmatprep.subr.bf16.mxu0 %v4015_v0  ;;  %2828 = vmatprep.subr.bf16.mxu1 %v4017_v5 }
 0x568   :  { %2798 = vmatpush1.bf16.msra.mxu0 %v4029_v17  ;;  %2830 = vmatpush1.bf16.msra.mxu1 %v4042_v50 }
 0x569   :  { %2800 = vmatprep.subr.bf16.mxu0 %v4044_v56  ;;  %2832 = vmatprep.subr.bf16.mxu1 %v4056_v46 }
 0x56c   :  { %2802 = vmatpush1.bf16.msra.mxu0 %v4068_v16  ;;  %2834 = vmatpush1.bf16.msra.mxu1 %v4072_v19 }
 0x56d   :  { %2836 = vmatprep.subr.bf16.mxu0 %v2835_v24  ;;  %2868 = vmatprep.subr.bf16.mxu1 %v2867_v60 }
 0x622   :  { %v1702_v33 = vpop.f32.mrb[10].mxu0  ;;  %v1773_v53 = vpop.f32.mrb[10].mxu1 }
 0x623   :  { %v2909_v34 = vadd.f32 %v1702_v33, %v3681_v35  ;;  %v1704_v45 = vpop.f32.mrb[11].mxu0  ;;  %v1775_v38 = vpop.f32.mrb[11].mxu1  ;;  %v2925_v29 = vadd.f32 %v1773_v53, %v3690_v59  ;;  %v2058_v33 = vld [vmem:[%s4268_s2 + $0x30] sm:$0xff] }
 0x624   :  { %v2910_v49 = vadd.f32 %v1704_v45, %v3683_v37  ;;  %v2926_v13 = vadd.f32 %v1775_v38, %v3687_v52  ;;  %v2869_v53 = vpack.c.bf16 %v2058_v33, %v2054_v2  ;;  %v2065_v45 = vld [vmem:[%s4268_s2 + $0x68] sm:$0xff]  ;;  %v2063_v38 = vld [vmem:[%s4268_s2 + $0x58] sm:$0xff] }
 0x625   :  { %v2311_v43 = vmul.f32 -1.442695, %v2909_v34  ;;  %v2061_v34 = vld [vmem:[%s4268_s2 + $0x48] sm:$0xff] }
 0x626   :  { %v2312_v6 = vmul.f32 -1.442695, %v2910_v49  ;;  %v2313_v25 = vmul.f32 -1.442695, %v2926_v13  ;;  %v2839_v49 = vpack.c.bf16 %v2065_v45, %v2061_v34  ;;  %v2064_v13 = vld [vmem:[%s4268_s2 + $0x60] sm:$0xff] }
 0x627   :  { %3044 = vpow2.f32 %v2311_v43  ;;  %v2067_v43 = vld [vmem:[%s4268_s2 + $0x78] sm:$0xff] }
 0x628   :  { %3046 = vpow2.f32 %v2312_v6  ;;  %v2060_v6 = vld [vmem:[%s4268_s2 + $0x40] sm:$0xff] }
 0x629   :  { %3048 = vpow2.f32 %v2313_v25  ;;  %v2871_v25 = vpack.c.bf16 %v2067_v43, %v2063_v38 }
 0x62a   :  { %3050 = vtanh.f32 %v2925_v29  ;;  %v2841_v29 = vpack.c.bf16 %v2064_v13, %v2060_v6 }
 0x631   :  { %v3045_v32 = vpop.eup %3044 }
 0x632   :  { %v3047_v40 = vpop.eup %3046  ;;  %v1785_v44 = vadd.f32 1.0, %v3045_v32  ;;  %v2062_v32 = vld [vmem:[%s4268_s2 + $0x50] sm:$0xff] }
 0x633   :  { %v1791_v48 = vadd.f32 1.0, %v3047_v40  ;;  %v3049_v58 = vpop.eup %3048  ;;  %v2066_v40 = vld [vmem:[%s4268_s2 + $0x70] sm:$0xff] }
 0x634   :  { %3052 = vrcp.f32 %v1785_v44  ;;  %v3051_v62 = vpop.eup %3050  ;;  %v1798_v21 = vadd.f32 1.0, %v3049_v58  ;;  %v2873_v44 = vpack.c.bf16 %v2066_v40, %v2062_v32 }
 0x635   :  { %3054 = vrcp.f32 %v1791_v48 }
 0x636   :  { %3056 = vrcp.f32 %v1798_v21 }
 0x63e   :  { %v3053_v4 = vpop.eup %3052 }
 0x63f   :  { %v3055_v18 = vpop.eup %3054  ;;  %v1802_v22 = vmul.f32 %v3053_v4, %v3051_v62 }
 0x640   :  { %v1801_v27 = vmul.f32 %v3055_v18, %v4129_v30  ;;  %v3057_v55 = vpop.eup %3056  ;;  %v2056_v30 = vld [vmem:[%s4268_s2 + $0x20] sm:$0xff] }
 0x642   :  { %v4172_v31 = vadd.f32 %v1802_v22, %v1801_v27 }
 0x644   :  { %3058 = vtanh.f32 %v4172_v31 }
 0x64e   :  { %v3059_v57 = vpop.eup %3058 }
 0x64f   :  { %v1805_v61 = vmul.f32 %v3059_v57, %v3057_v55 }
 0x651   :  { %2314 = vst [vmem:[%s4271_s4 + $0x28] sm:$0xff] %v1805_v61  ;;  %1941 = vmatmul.mubr.f32.vlgmr.msra.gmra.mrb[12].mxu0 %v1805_v61  ;;  %2012 = vmatmul.mubr.f32.vlgmr.msra.gmra.mrb[12].mxu1 %v1805_v61 }
 0x652   :  { %2180 = vmatprep.mubr.f32.mxu0 %v3092_v3  ;;  %2251 = vmatprep.mubr.f32.mxu1 %v3092_v3  ;;  %v2052_v3 = vld [vmem:[%s4268_s2] sm:$0xff] }
 0x653   :  { %v2837_v42 = vpack.c.bf16 %v2056_v30, %v2052_v3  ;;  %2870 = vmatpush1.bf16.msra.mxu1 %v2869_v53 }
 0x654   :  { %2872 = vmatprep.subr.bf16.mxu1 %v2871_v25 }
 0x655   :  { %2838 = vmatpush1.bf16.msra.mxu0 %v2837_v42 }
 0x656   :  { %2840 = vmatprep.subr.bf16.mxu0 %v2839_v49 }
 0x657   :  { %2874 = vmatpush1.bf16.msra.mxu1 %v2873_v44 }
 0x658   :  { %2876 = vmatprep.subr.bf16.mxu1 %v3881_v11 }
 0x659   :  { %2842 = vmatpush1.bf16.msra.mxu0 %v2841_v29 }
 0x65a   :  { %2844 = vmatprep.subr.bf16.mxu0 %v3870_v1 }
 0x65b   :  { %2878 = vmatpush1.bf16.msra.mxu1 %v3892_v20 }
 0x65c   :  { %2880 = vmatprep.subr.bf16.mxu1 %v3917_v63 }
 0x65d   :  { %2846 = vmatpush1.bf16.msra.mxu0 %v3883_v12 }
 0x65e   :  { %2848 = vmatprep.subr.bf16.mxu0 %v3906_v47 }
 0x65f   :  { %2882 = vmatpush1.bf16.msra.mxu1 %v3928_v41 }
 0x660   :  { %2884 = vmatprep.subr.bf16.mxu1 %v3953_v23 }
 0x661   :  { %2850 = vmatpush1.bf16.msra.mxu0 %v3919_v39 }
 0x662   :  { %2852 = vmatprep.subr.bf16.mxu0 %v3942_v10 }
 0x663   :  { %2886 = vmatpush1.bf16.msra.mxu1 %v3964_v36 }
 0x664   :  { %2888 = vmatprep.subr.bf16.mxu1 %v3989_v9 }
 0x665   :  { %2854 = vmatpush1.bf16.msra.mxu0 %v3955_v26 }
 0x666   :  { %2856 = vmatprep.subr.bf16.mxu0 %v3977_v54 }
 0x667   :  { %2890 = vmatpush1.bf16.msra.mxu1 %v4003_v51 }
 0x668   :  { %2892 = vmatprep.subr.bf16.mxu1 %v4017_v5 }
 0x669   :  { %2858 = vmatpush1.bf16.msra.mxu0 %v3991_v14 }
 0x66a   :  { %2860 = vmatprep.subr.bf16.mxu0 %v4015_v0 }
 0x66b   :  { %2894 = vmatpush1.bf16.msra.mxu1 %v4042_v50 }
 0x66c   :  { %2896 = vmatprep.subr.bf16.mxu1 %v4056_v46 }
 0x66d   :  { %2862 = vmatpush1.bf16.msra.mxu0 %v4029_v17 }
 0x66e   :  { %2864 = vmatprep.subr.bf16.mxu0 %v4044_v56 }
 0x66f   :  { %2898 = vmatpush1.bf16.msra.mxu1 %v4072_v19 }
 0x671   :  { %2866 = vmatpush1.bf16.msra.mxu0 %v4068_v16 }
 0x724   :  { %v1942_v1 = vpop.f32.mrb[12].mxu0  ;;  %v2013_v11 = vpop.f32.mrb[12].mxu1 }
 0x725   :  { %v2911_v12 = vadd.f32 %v1942_v1, %v3681_v35  ;;  %v1944_v20 = vpop.f32.mrb[13].mxu0  ;;  %v2015_v47 = vpop.f32.mrb[13].mxu1  ;;  %v2927_v26 = vadd.f32 %v2013_v11, %v3690_v59 }
 0x726   :  { %v2912_v63 = vadd.f32 %v1944_v20, %v3683_v37  ;;  %v2928_v10 = vadd.f32 %v2015_v47, %v3687_v52 }
 0x727   :  { %v2315_v39 = vmul.f32 -1.442695, %v2911_v12 }
 0x728   :  { %v2316_v41 = vmul.f32 -1.442695, %v2912_v63  ;;  %v2317_v23 = vmul.f32 -1.442695, %v2928_v10 }
 0x729   :  { %3060 = vpow2.f32 %v2315_v39 }
 0x72a   :  { %3062 = vpow2.f32 %v2316_v41 }
 0x72b   :  { %3064 = vpow2.f32 %v2317_v23 }
 0x72c   :  { %3066 = vtanh.f32 %v2927_v26 }
 0x733   :  { %v3061_v36 = vpop.eup %3060 }
 0x734   :  { %v3063_v54 = vpop.eup %3062  ;;  %v2025_v9 = vadd.f32 1.0, %v3061_v36 }
 0x735   :  { %v2031_v14 = vadd.f32 1.0, %v3063_v54  ;;  %v3065_v51 = vpop.eup %3064 }
 0x736   :  { %3068 = vrcp.f32 %v2025_v9  ;;  %v3067_v0 = vpop.eup %3066  ;;  %v2038_v56 = vadd.f32 1.0, %v3065_v51 }
 0x737   :  { %3070 = vrcp.f32 %v2031_v14 }
 0x738   :  { %3072 = vrcp.f32 %v2038_v56 }
 0x740   :  { %v3069_v5 = vpop.eup %3068 }
 0x741   :  { %v3071_v17 = vpop.eup %3070  ;;  %v2042_v50 = vmul.f32 %v3069_v5, %v3067_v0 }
 0x742   :  { %v2041_v46 = vmul.f32 %v3071_v17, %v4172_v31  ;;  %v3073_v19 = vpop.eup %3072 }
 0x744   :  { %v2043_v16 = vadd.f32 %v2042_v50, %v2041_v46 }
 0x746   :  { %3074 = vtanh.f32 %v2043_v16 }
 0x750   :  { %v3075_v48 = vpop.eup %3074 }
 0x751   :  { %v2045_v58 = vmul.f32 %v3075_v48, %v3073_v19 }
 0x753   :  { %2318 = vst [vmem:[%s4271_s4 + $0x30] sm:$0xff] %v2045_v58  ;;  %2181 = vmatmul.mubr.f32.vlgmr.msra.gmra.mrb[14].mxu0 %v2045_v58  ;;  %2252 = vmatmul.mubr.f32.vlgmr.msra.gmra.mrb[14].mxu1 %v2045_v58 }
 0x826   :  { %v2182_v62 = vpop.f32.mrb[14].mxu0  ;;  %v2253_v4 = vpop.f32.mrb[14].mxu1 }
 0x827   :  { %v2913_v18 = vadd.f32 %v2182_v62, %v3681_v35  ;;  %v2184_v22 = vpop.f32.mrb[15].mxu0  ;;  %v2255_v21 = vpop.f32.mrb[15].mxu1  ;;  %v2929_v7 = vadd.f32 %v2253_v4, %v3690_v59 }
 0x828   :  { %v2914_v27 = vadd.f32 %v2184_v22, %v3683_v37  ;;  %v2930_v57 = vadd.f32 %v2255_v21, %v3687_v52 }
 0x829   :  { %v2319_v31 = vmul.f32 -1.442695, %v2913_v18 }
 0x82a   :  { %v2320_v55 = vmul.f32 -1.442695, %v2914_v27  ;;  %v2321_v61 = vmul.f32 -1.442695, %v2930_v57 }
 0x82b   :  { %3076 = vpow2.f32 %v2319_v31 }
 0x82c   :  { %3078 = vpow2.f32 %v2320_v55 }
 0x82d   :  { %3080 = vpow2.f32 %v2321_v61 }
 0x82e   :  { %3082 = vtanh.f32 %v2929_v7 }
 0x835   :  { %v3077_v8 = vpop.eup %3076 }
 0x836   :  { %v3079_v15 = vpop.eup %3078  ;;  %v2265_v24 = vadd.f32 1.0, %v3077_v8 }
 0x837   :  { %v2271_v28 = vadd.f32 1.0, %v3079_v15  ;;  %v3081_v35 = vpop.eup %3080 }
 0x838   :  { %3084 = vrcp.f32 %v2265_v24  ;;  %v3083_v3 = vpop.eup %3082  ;;  %v2278_v42 = vadd.f32 1.0, %v3081_v35 }
 0x839   :  { %3086 = vrcp.f32 %v2271_v28 }
 0x83a   :  { %3088 = vrcp.f32 %v2278_v42 }
 0x842   :  { %v3085_v37 = vpop.eup %3084 }
 0x843   :  { %v3087_v30 = vpop.eup %3086  ;;  %v2282_v60 = vmul.f32 %v3085_v37, %v3083_v3 }
 0x844   :  { %v2281_v2 = vmul.f32 %v3087_v30, %v2043_v16  ;;  %v3089_v52 = vpop.eup %3088 }
 0x846   :  { %v2283_v33 = vadd.f32 %v2282_v60, %v2281_v2 }
 0x848   :  { %3090 = vtanh.f32 %v2283_v33 }
 0x852   :  { %v3091_v59 = vpop.eup %3090 }
 0x853   :  { %v2285_v53 = vmul.f32 %v3091_v59, %v3089_v52 }
 0x855   :  { %2322 = vst [vmem:[%s4271_s4 + $0x38] sm:$0xff] %v2285_v53 }

</bundles_post_ra>
